<compile_context>
chip_gen: v6e
topology: v6e:2x2x1
jax: 0.10.0
libtpu: 0.0.40
codegen_flags: <defaults>
</compile_context>

<pallas_src>
import functools

import numpy as np
import jax
import jax.numpy as jnp
from jax.experimental import pallas as pl
from jax.experimental.pallas import tpu as pltpu


# ----------------------------------------------------------------------------
# Glue: sinusoidal relative-position matrix (port of matrixR)
# ----------------------------------------------------------------------------
def matrix_r(L, d_model, ex=False):
    inv_freq = 1.0 / (10000.0 ** (jnp.arange(0.0, d_model, 2.0) / d_model))
    pos = jnp.arange(-L + 1.0, L + 0.0) if ex else jnp.arange(0.0, L)
    sinusoid = jnp.outer(pos, inv_freq)
    mat = jnp.zeros((pos.shape[0], d_model), dtype=jnp.float32)
    mat = mat.at[:, 0::2].set(jnp.sin(sinusoid))
    mat = mat.at[:, 1::2].set(jnp.cos(sinusoid))
    return mat


def _dot_nt(a, b):
    # a @ b.T without materializing an in-kernel transpose (contract last dims).
    return jax.lax.dot_general(a, b, (((1,), (1,)), ((), ())),
                               preferred_element_type=jnp.float32)


# ----------------------------------------------------------------------------
# The fused Pallas kernel (one batch element per grid step)
# ----------------------------------------------------------------------------
def rel_attn_kernel(x_ref, y_ref, qpos_ref, wq_ref, wev_ref, cb_ref, pb_ref,
                    wo_wt_ref, wo_b_ref, gamma_ref, beta_ref, out_ref, abd_ref,
                    *, n_heads, head_dim, mm_dtype):
    Xf = x_ref[0]                       # (L, d) f32 -- residual / LayerNorm path
    Xc = Xf.astype(mm_dtype)            # matmul input
    Yc = y_ref[0]                       # (L, d) mm_dtype
    Qp = qpos_ref[...]                  # (2L-1, d) mm_dtype, precomputed R @ Wr

    L = Xf.shape[0]
    d = Xf.shape[1]
    H = head_dim
    W = 2 * L - 1

    # --- Fused input projections (MXU, full-d contraction, f32 accumulation) ---
    q_full = jnp.dot(Xc, wq_ref[...], preferred_element_type=jnp.float32)     # (L, d)
    kv_full = jnp.dot(Yc, wev_ref[...], preferred_element_type=jnp.float32)   # (L, 2d)
    k_full = kv_full[:, :d]
    v_full = kv_full[:, d:]

    cb = cb_ref[...]                    # (1, d) f32
    pb = pb_ref[...]                    # (1, d) f32

    # --- Per-head score matmuls (contraction dim = head_dim) ---
    s_list, bd_list, v_list = [], [], []
    for h in range(n_heads):
        sl = slice(h * H, (h + 1) * H)
        q_h = q_full[:, sl]
        k_h = k_full[:, sl].astype(mm_dtype)
        # Fold the biases into the query BEFORE the matmuls:
        #   (q + cb) k^T = A_a + A_c     and     (q + pb) Q^T = B + D
        qc = (q_h + cb[:, sl]).astype(mm_dtype)
        qp = (q_h + pb[:, sl]).astype(mm_dtype)
        s_list.append(_dot_nt(qc, k_h))            # (L, L)   content terms
        bd_list.append(_dot_nt(qp, Qp[:, sl]))     # (L, 2L-1) relative terms (B + D)
        v_list.append(v_full[:, sl].astype(mm_dtype))

    S = jnp.stack(s_list, axis=0)       # (h, L, L)   f32
    BD = jnp.stack(bd_list, axis=0)     # (h, L, W)   f32
    V = jnp.stack(v_list, axis=0)       # (h, L, H)   mm_dtype

    # --- Relative shift:  A_bd[h, i, j] = BD[h, i, L-1 + j - i] ---
    # Realized with L static row slices into a small VMEM scratch (O(L^2) moves),
    # instead of the old O(L^3) dense-selector contraction.
    for i in range(L):
        abd_ref[:, i, :] = BD[:, i, L - 1 - i: 2 * L - 1 - i]
    A_bd = abd_ref[...]                 # (h, L, L)

    # Doubled main diagonal from the reference's overlapping tril(1)/triu(0).
    row = jax.lax.broadcasted_iota(jnp.int32, (L, L), 0)
    col = jax.lax.broadcasted_iota(jnp.int32, (L, L), 1)
    diag = BD[:, :, L - 1:L]            # (h, L, 1)
    A = S + A_bd + jnp.where((row == col)[None, :, :], diag, 0.0)

    # --- Softmax (f32; divide on the EUP via approx reciprocal) ---
    A = A - jnp.max(A, axis=-1, keepdims=True)
    e = jnp.exp(A)
    p = e * pl.reciprocal(jnp.sum(e, axis=-1, keepdims=True), approx=True)

    # --- attn @ v, batched over heads ---
    Oh = jnp.einsum('hqk,hkd->hqd', p.astype(mm_dtype), V,
                    preferred_element_type=jnp.float32)        # (h, L, H) f32

    # --- Output projection: accumulate O @ Wo^T head-by-head (no in-kernel concat) ---
    proj = jnp.zeros((L, d), dtype=jnp.float32) + wo_b_ref[...]
    wo_wt = wo_wt_ref[...]              # (d, d) mm_dtype, already transposed
    for h in range(n_heads):
        proj = proj + jnp.dot(Oh[h].astype(mm_dtype), wo_wt[h * H:(h + 1) * H, :],
                              preferred_element_type=jnp.float32)

    # --- Residual + LayerNorm (dropout = identity, eval mode), f32 ---
    Z = Xf + proj
    mean = jnp.mean(Z, axis=-1, keepdims=True)
    var = jnp.mean((Z - mean) ** 2, axis=-1, keepdims=True)
    Zn = (Z - mean) * jax.lax.rsqrt(var + 1e-5)
    out_ref[0] = Zn * gamma_ref[...] + beta_ref[...]


# ----------------------------------------------------------------------------
# Wrapper
# ----------------------------------------------------------------------------
def relative_attention(X, Y, params, n_heads, matmul_dtype=jnp.bfloat16):
    N, L1, d = X.shape
    L2 = Y.shape[1]
    assert d % n_heads == 0
    assert L1 == L2, "kernel implements the L1 == L2 case"
    H = d // n_heads
    W = 2 * L2 - 1

    # Batch-invariant precompute, hoisted out of the grid:
    R = matrix_r(L2, d, ex=True).astype(jnp.float32)
    Qpos = jnp.dot(R, params["Wr"]).astype(matmul_dtype)                 # (2L-1, d)
    Wq = params["Wq"].astype(matmul_dtype)
    Wev = jnp.concatenate([params["We"], params["Wv"]], axis=1).astype(matmul_dtype)  # (d, 2d)
    Wo_wt = params["Wo_w"].T.astype(matmul_dtype)                        # use as O @ Wo_wt
    Yc = Y.astype(matmul_dtype)

    to2d = lambda a: a.reshape(1, d)
    const2 = lambda n: (0, 0)
    kernel = functools.partial(rel_attn_kernel, n_heads=n_heads, head_dim=H,
                               mm_dtype=matmul_dtype)

    out = pl.pallas_call(
        kernel,
        out_shape=jax.ShapeDtypeStruct((N, L1, d), jnp.float32),
        grid=(N,),
        in_specs=[
            pl.BlockSpec((1, L1, d), lambda n: (n, 0, 0)),   # X (f32, residual + matmul)
            pl.BlockSpec((1, L2, d), lambda n: (n, 0, 0)),   # Y (matmul dtype)
            pl.BlockSpec((W, d), const2),                    # Qpos = R @ Wr (hoisted)
            pl.BlockSpec((d, d), const2),                    # Wq
            pl.BlockSpec((d, 2 * d), const2),                # [We | Wv] packed
            pl.BlockSpec((1, d), const2),                    # cb
            pl.BlockSpec((1, d), const2),                    # pb
            pl.BlockSpec((d, d), const2),                    # Wo weight (pre-transposed)
            pl.BlockSpec((1, d), const2),                    # Wo bias
            pl.BlockSpec((1, d), const2),                    # LayerNorm gamma
            pl.BlockSpec((1, d), const2),                    # LayerNorm beta
        ],
        out_specs=pl.BlockSpec((1, L1, d), lambda n: (n, 0, 0)),
        scratch_shapes=[pltpu.VMEM((n_heads, L1, L2), jnp.float32)],     # shifted B+D
        compiler_params=pltpu.CompilerParams(dimension_semantics=("parallel",)),
    )(X, Yc, Qpos, Wq, Wev,
      to2d(params["cb"]), to2d(params["pb"]),
      Wo_wt, to2d(params["Wo_b"]),
      to2d(params["gamma"]), to2d(params["beta"]))
    return out


# ----------------------------------------------------------------------------
# Pure-JAX reference (direct port of the PyTorch forward, L1 == L2, eval mode)
# ----------------------------------------------------------------------------
def shift_rows_ref(M):
    N, h, L, _ = M.shape
    M1 = M[..., :L]
    M2 = M[..., L - 1:]
    zero = jnp.zeros((N, h, L, 1), M.dtype)
    SM1 = jnp.concatenate([zero, M1], -1).reshape(N, h, -1, L)[:, :, 1:, :]
    SM1 = jnp.tril(SM1, 1)
    SM2 = jnp.concatenate([M2, zero], -1).reshape(N, h, -1, L)[:, :, :-1, :]
    SM2 = jnp.triu(SM2, 0)
    return SM1 + SM2


def relative_attention_ref(X, Y, params, n_heads):
    N, L1, d = X.shape
    L2 = Y.shape[1]
    H = d // n_heads
    R = matrix_r(L2, d, ex=True).astype(X.dtype)
    q = (X @ params["Wq"]).reshape(N, L1, n_heads, H).transpose(0, 2, 1, 3)
    k = (Y @ params["We"]).reshape(N, L2, n_heads, H).transpose(0, 2, 1, 3)
    v = (Y @ params["Wv"]).reshape(N, L2, n_heads, H).transpose(0, 2, 1, 3)
    Q = (R @ params["Wr"]).reshape(1, 2 * L2 - 1, n_heads, H).transpose(0, 2, 1, 3)
    pb = jnp.broadcast_to(params["pb"].reshape(1, n_heads, 1, H), (N, n_heads, L1, H))
    cb = jnp.broadcast_to(params["cb"].reshape(1, n_heads, 1, H), (N, n_heads, L1, H))
    B = q @ jnp.swapaxes(Q, -2, -1)
    D = pb @ jnp.swapaxes(Q, -2, -1)
    A_a = q @ jnp.swapaxes(k, -2, -1)
    A_c = cb @ jnp.swapaxes(k, -2, -1)
    A = A_a + shift_rows_ref(B) + A_c + shift_rows_ref(D)
    p = jax.nn.softmax(A, axis=-1)
    Oh = p @ v
    O = jnp.swapaxes(Oh, 1, 2).reshape(N, L1, d)
    Z = X + (O @ params["Wo_w"].T + params["Wo_b"])
    mean = Z.mean(-1, keepdims=True)
    var = ((Z - mean) ** 2).mean(-1, keepdims=True)
    return (Z - mean) / jnp.sqrt(var + 1e-5) * params["gamma"] + params["beta"]


if __name__ == "__main__":
    N, L, d_model, n_heads = 2, 8, 32, 4

    key = jax.random.PRNGKey(0)
    kx, ky, k1, k2, k3, k4, k5, k6, k7, k8 = jax.random.split(key, 10)
    X = jax.random.normal(kx, (N, L, d_model), dtype=jnp.float32)
    Y = jax.random.normal(ky, (N, L, d_model), dtype=jnp.float32)

    # Deterministic parameter init (kaiming_uniform_(a=sqrt(5)) bound = 1/sqrt(fan_in)).
    bound = 1.0 / np.sqrt(d_model)
    u = lambda k, shape: jax.random.uniform(k, shape, jnp.float32, -bound, bound)
    params = dict(
        Wq=u(k1, (d_model, d_model)),
        We=u(k2, (d_model, d_model)),
        Wv=u(k3, (d_model, d_model)),
        Wr=u(k4, (d_model, d_model)),
        # nn.Parameter(torch.zeros(d)) in the module; small non-zero values here so
        # the content/position bias paths are actually exercised.
        cb=u(k7, (d_model,)) * 0.1,
        pb=u(k8, (d_model,)) * 0.1,
        Wo_w=u(k5, (d_model, d_model)),
        Wo_b=u(k6, (d_model,)),
        gamma=jnp.ones((d_model,), jnp.float32),
        beta=jnp.zeros((d_model,), jnp.float32),
    )

    ref = relative_attention_ref(X, Y, params, n_heads)

    # Full-precision path: tight check against the reference.
    out_f32 = relative_attention(X, Y, params, n_heads, matmul_dtype=jnp.float32)
    out_f32 = jax.block_until_ready(out_f32)
    np.testing.assert_allclose(np.asarray(out_f32), np.asarray(ref), rtol=2e-2, atol=2e-2)

    # Default bf16-MXU path (f32 accumulation / softmax / LayerNorm): looser check.
    out_bf16 = relative_attention(X, Y, params, n_heads)
    out_bf16 = jax.block_until_ready(out_bf16)
    np.testing.assert_allclose(np.asarray(out_bf16), np.asarray(ref), rtol=1e-1, atol=1e-1)

    print("KERNEL_OK")
</pallas_src>

<mosaic_0001>
module attributes {stable_mosaic.version = 11 : i64} {
  func.func @rel_attn_kernel(%arg0: i32, %arg1: memref<1x8x32xf32, #tpu.memory_space<vmem>>, %arg2: memref<1x8x32xf32, #tpu.memory_space<vmem>>, %arg3: memref<15x32xf32, #tpu.memory_space<vmem>>, %arg4: memref<32x32xf32, #tpu.memory_space<vmem>>, %arg5: memref<32x64xf32, #tpu.memory_space<vmem>>, %arg6: memref<1x32xf32, #tpu.memory_space<vmem>>, %arg7: memref<1x32xf32, #tpu.memory_space<vmem>>, %arg8: memref<32x32xf32, #tpu.memory_space<vmem>>, %arg9: memref<1x32xf32, #tpu.memory_space<vmem>>, %arg10: memref<1x32xf32, #tpu.memory_space<vmem>>, %arg11: memref<1x32xf32, #tpu.memory_space<vmem>>, %arg12: memref<1x8x32xf32, #tpu.memory_space<vmem>>, %arg13: memref<4x8x8xf32, #tpu.memory_space<vmem>>) attributes {dimension_semantics = [#tpu.dimension_semantics<parallel>], iteration_bounds = array<i64: 2>, scalar_prefetch = 0 : i64, scratch_operands = 1 : i64, tpu.core_type = #tpu.core_type<tc>, window_params = [{transform_indices = @transform_0, window_bounds = array<i64: 1, 8, 32>}, {transform_indices = @transform_1, window_bounds = array<i64: 1, 8, 32>}, {pipeline_mode = #tpu.pipeline_mode<synchronous>, transform_indices = @transform_2, window_bounds = array<i64: 15, 32>}, {pipeline_mode = #tpu.pipeline_mode<synchronous>, transform_indices = @transform_3, window_bounds = array<i64: 32, 32>}, {pipeline_mode = #tpu.pipeline_mode<synchronous>, transform_indices = @transform_4, window_bounds = array<i64: 32, 64>}, {pipeline_mode = #tpu.pipeline_mode<synchronous>, transform_indices = @transform_5, window_bounds = array<i64: 1, 32>}, {pipeline_mode = #tpu.pipeline_mode<synchronous>, transform_indices = @transform_6, window_bounds = array<i64: 1, 32>}, {pipeline_mode = #tpu.pipeline_mode<synchronous>, transform_indices = @transform_7, window_bounds = array<i64: 32, 32>}, {pipeline_mode = #tpu.pipeline_mode<synchronous>, transform_indices = @transform_8, window_bounds = array<i64: 1, 32>}, {pipeline_mode = #tpu.pipeline_mode<synchronous>, transform_indices = @transform_9, window_bounds = array<i64: 1, 32>}, {pipeline_mode = #tpu.pipeline_mode<synchronous>, transform_indices = @transform_10, window_bounds = array<i64: 1, 32>}, {transform_indices = @transform_11, window_bounds = array<i64: 1, 8, 32>}]} {
    %c0 = arith.constant 0 : index
    %c0_0 = arith.constant 0 : index
    %c0_1 = arith.constant 0 : index
    %0 = vector.load %arg1[%c0, %c0_0, %c0_1] : memref<1x8x32xf32, #tpu.memory_space<vmem>>, vector<1x8x32xf32>
    %1 = vector.shape_cast %0 : vector<1x8x32xf32> to vector<8x32xf32>
    %c0_2 = arith.constant 0 : index
    %c0_3 = arith.constant 0 : index
    %c0_4 = arith.constant 0 : index
    %2 = vector.load %arg2[%c0_2, %c0_3, %c0_4] : memref<1x8x32xf32, #tpu.memory_space<vmem>>, vector<1x8x32xf32>
    %3 = vector.shape_cast %2 : vector<1x8x32xf32> to vector<8x32xf32>
    %c0_5 = arith.constant 0 : index
    %c0_6 = arith.constant 0 : index
    %4 = vector.load %arg3[%c0_5, %c0_6] : memref<15x32xf32, #tpu.memory_space<vmem>>, vector<15x32xf32>
    %c0_7 = arith.constant 0 : index
    %c0_8 = arith.constant 0 : index
    %5 = vector.load %arg4[%c0_7, %c0_8] : memref<32x32xf32, #tpu.memory_space<vmem>>, vector<32x32xf32>
    %cst = arith.constant dense<0.000000e+00> : vector<8x32xf32>
    %6 = tpu.matmul %1, %5, %cst {dimension_numbers = #tpu.dot_dimension_numbers<[1], [0], [0], [1], [0, 0, 1, 1], [], []>} : vector<8x32xf32>, vector<32x32xf32>, vector<8x32xf32> -> vector<8x32xf32>
    %c0_9 = arith.constant 0 : index
    %c0_10 = arith.constant 0 : index
    %7 = vector.load %arg5[%c0_9, %c0_10] : memref<32x64xf32, #tpu.memory_space<vmem>>, vector<32x64xf32>
    %cst_11 = arith.constant dense<0.000000e+00> : vector<8x64xf32>
    %8 = tpu.matmul %3, %7, %cst_11 {dimension_numbers = #tpu.dot_dimension_numbers<[1], [0], [0], [1], [0, 0, 1, 1], [], []>} : vector<8x32xf32>, vector<32x64xf32>, vector<8x64xf32> -> vector<8x64xf32>
    %9 = vector.extract_strided_slice %8 {offsets = [0, 0], sizes = [8, 32], strides = [1, 1]} : vector<8x64xf32> to vector<8x32xf32>
    %10 = vector.extract_strided_slice %8 {offsets = [0, 32], sizes = [8, 32], strides = [1, 1]} : vector<8x64xf32> to vector<8x32xf32>
    %c0_12 = arith.constant 0 : index
    %c0_13 = arith.constant 0 : index
    %11 = vector.load %arg6[%c0_12, %c0_13] : memref<1x32xf32, #tpu.memory_space<vmem>>, vector<1x32xf32>
    %c0_14 = arith.constant 0 : index
    %c0_15 = arith.constant 0 : index
    %12 = vector.load %arg7[%c0_14, %c0_15] : memref<1x32xf32, #tpu.memory_space<vmem>>, vector<1x32xf32>
    %13 = vector.extract_strided_slice %6 {offsets = [0, 0], sizes = [8, 8], strides = [1, 1]} : vector<8x32xf32> to vector<8x8xf32>
    %14 = vector.extract_strided_slice %9 {offsets = [0, 0], sizes = [8, 8], strides = [1, 1]} : vector<8x32xf32> to vector<8x8xf32>
    %15 = vector.extract_strided_slice %11 {offsets = [0, 0], sizes = [1, 8], strides = [1, 1]} : vector<1x32xf32> to vector<1x8xf32>
    %16 = vector.broadcast %15 : vector<1x8xf32> to vector<8x8xf32>
    %17 = arith.addf %13, %16 : vector<8x8xf32>
    %18 = vector.extract_strided_slice %12 {offsets = [0, 0], sizes = [1, 8], strides = [1, 1]} : vector<1x32xf32> to vector<1x8xf32>
    %19 = vector.broadcast %18 : vector<1x8xf32> to vector<8x8xf32>
    %20 = arith.addf %13, %19 : vector<8x8xf32>
    %cst_16 = arith.constant dense<0.000000e+00> : vector<8x8xf32>
    %21 = tpu.matmul %17, %14, %cst_16 {dimension_numbers = #tpu.dot_dimension_numbers<[1], [1], [0], [0], [0, 0, 1, 0], [], []>} : vector<8x8xf32>, vector<8x8xf32>, vector<8x8xf32> -> vector<8x8xf32>
    %22 = vector.extract_strided_slice %4 {offsets = [0, 0], sizes = [15, 8], strides = [1, 1]} : vector<15x32xf32> to vector<15x8xf32>
    %cst_17 = arith.constant dense<0.000000e+00> : vector<8x15xf32>
    %23 = tpu.matmul %20, %22, %cst_17 {dimension_numbers = #tpu.dot_dimension_numbers<[1], [1], [0], [0], [0, 0, 1, 0], [], []>} : vector<8x8xf32>, vector<15x8xf32>, vector<8x15xf32> -> vector<8x15xf32>
    %24 = vector.extract_strided_slice %10 {offsets = [0, 0], sizes = [8, 8], strides = [1, 1]} : vector<8x32xf32> to vector<8x8xf32>
    %25 = vector.extract_strided_slice %6 {offsets = [0, 8], sizes = [8, 8], strides = [1, 1]} : vector<8x32xf32> to vector<8x8xf32>
    %26 = vector.extract_strided_slice %9 {offsets = [0, 8], sizes = [8, 8], strides = [1, 1]} : vector<8x32xf32> to vector<8x8xf32>
    %27 = vector.extract_strided_slice %11 {offsets = [0, 8], sizes = [1, 8], strides = [1, 1]} : vector<1x32xf32> to vector<1x8xf32>
    %28 = vector.broadcast %27 : vector<1x8xf32> to vector<8x8xf32>
    %29 = arith.addf %25, %28 : vector<8x8xf32>
    %30 = vector.extract_strided_slice %12 {offsets = [0, 8], sizes = [1, 8], strides = [1, 1]} : vector<1x32xf32> to vector<1x8xf32>
    %31 = vector.broadcast %30 : vector<1x8xf32> to vector<8x8xf32>
    %32 = arith.addf %25, %31 : vector<8x8xf32>
    %cst_18 = arith.constant dense<0.000000e+00> : vector<8x8xf32>
    %33 = tpu.matmul %29, %26, %cst_18 {dimension_numbers = #tpu.dot_dimension_numbers<[1], [1], [0], [0], [0, 0, 1, 0], [], []>} : vector<8x8xf32>, vector<8x8xf32>, vector<8x8xf32> -> vector<8x8xf32>
    %34 = vector.extract_strided_slice %4 {offsets = [0, 8], sizes = [15, 8], strides = [1, 1]} : vector<15x32xf32> to vector<15x8xf32>
    %cst_19 = arith.constant dense<0.000000e+00> : vector<8x15xf32>
    %35 = tpu.matmul %32, %34, %cst_19 {dimension_numbers = #tpu.dot_dimension_numbers<[1], [1], [0], [0], [0, 0, 1, 0], [], []>} : vector<8x8xf32>, vector<15x8xf32>, vector<8x15xf32> -> vector<8x15xf32>
    %36 = vector.extract_strided_slice %10 {offsets = [0, 8], sizes = [8, 8], strides = [1, 1]} : vector<8x32xf32> to vector<8x8xf32>
    %37 = vector.extract_strided_slice %6 {offsets = [0, 16], sizes = [8, 8], strides = [1, 1]} : vector<8x32xf32> to vector<8x8xf32>
    %38 = vector.extract_strided_slice %9 {offsets = [0, 16], sizes = [8, 8], strides = [1, 1]} : vector<8x32xf32> to vector<8x8xf32>
    %39 = vector.extract_strided_slice %11 {offsets = [0, 16], sizes = [1, 8], strides = [1, 1]} : vector<1x32xf32> to vector<1x8xf32>
    %40 = vector.broadcast %39 : vector<1x8xf32> to vector<8x8xf32>
    %41 = arith.addf %37, %40 : vector<8x8xf32>
    %42 = vector.extract_strided_slice %12 {offsets = [0, 16], sizes = [1, 8], strides = [1, 1]} : vector<1x32xf32> to vector<1x8xf32>
    %43 = vector.broadcast %42 : vector<1x8xf32> to vector<8x8xf32>
    %44 = arith.addf %37, %43 : vector<8x8xf32>
    %cst_20 = arith.constant dense<0.000000e+00> : vector<8x8xf32>
    %45 = tpu.matmul %41, %38, %cst_20 {dimension_numbers = #tpu.dot_dimension_numbers<[1], [1], [0], [0], [0, 0, 1, 0], [], []>} : vector<8x8xf32>, vector<8x8xf32>, vector<8x8xf32> -> vector<8x8xf32>
    %46 = vector.extract_strided_slice %4 {offsets = [0, 16], sizes = [15, 8], strides = [1, 1]} : vector<15x32xf32> to vector<15x8xf32>
    %cst_21 = arith.constant dense<0.000000e+00> : vector<8x15xf32>
    %47 = tpu.matmul %44, %46, %cst_21 {dimension_numbers = #tpu.dot_dimension_numbers<[1], [1], [0], [0], [0, 0, 1, 0], [], []>} : vector<8x8xf32>, vector<15x8xf32>, vector<8x15xf32> -> vector<8x15xf32>
    %48 = vector.extract_strided_slice %10 {offsets = [0, 16], sizes = [8, 8], strides = [1, 1]} : vector<8x32xf32> to vector<8x8xf32>
    %49 = vector.extract_strided_slice %6 {offsets = [0, 24], sizes = [8, 8], strides = [1, 1]} : vector<8x32xf32> to vector<8x8xf32>
    %50 = vector.extract_strided_slice %9 {offsets = [0, 24], sizes = [8, 8], strides = [1, 1]} : vector<8x32xf32> to vector<8x8xf32>
    %51 = vector.extract_strided_slice %11 {offsets = [0, 24], sizes = [1, 8], strides = [1, 1]} : vector<1x32xf32> to vector<1x8xf32>
    %52 = vector.broadcast %51 : vector<1x8xf32> to vector<8x8xf32>
    %53 = arith.addf %49, %52 : vector<8x8xf32>
    %54 = vector.extract_strided_slice %12 {offsets = [0, 24], sizes = [1, 8], strides = [1, 1]} : vector<1x32xf32> to vector<1x8xf32>
    %55 = vector.broadcast %54 : vector<1x8xf32> to vector<8x8xf32>
    %56 = arith.addf %49, %55 : vector<8x8xf32>
    %cst_22 = arith.constant dense<0.000000e+00> : vector<8x8xf32>
    %57 = tpu.matmul %53, %50, %cst_22 {dimension_numbers = #tpu.dot_dimension_numbers<[1], [1], [0], [0], [0, 0, 1, 0], [], []>} : vector<8x8xf32>, vector<8x8xf32>, vector<8x8xf32> -> vector<8x8xf32>
    %58 = vector.extract_strided_slice %4 {offsets = [0, 24], sizes = [15, 8], strides = [1, 1]} : vector<15x32xf32> to vector<15x8xf32>
    %cst_23 = arith.constant dense<0.000000e+00> : vector<8x15xf32>
    %59 = tpu.matmul %56, %58, %cst_23 {dimension_numbers = #tpu.dot_dimension_numbers<[1], [1], [0], [0], [0, 0, 1, 0], [], []>} : vector<8x8xf32>, vector<15x8xf32>, vector<8x15xf32> -> vector<8x15xf32>
    %60 = vector.extract_strided_slice %10 {offsets = [0, 24], sizes = [8, 8], strides = [1, 1]} : vector<8x32xf32> to vector<8x8xf32>
    %61 = vector.shape_cast %21 : vector<8x8xf32> to vector<1x8x8xf32>
    %62 = vector.shape_cast %33 : vector<8x8xf32> to vector<1x8x8xf32>
    %63 = vector.shape_cast %45 : vector<8x8xf32> to vector<1x8x8xf32>
    %64 = vector.shape_cast %57 : vector<8x8xf32> to vector<1x8x8xf32>
    %65 = tpu.concatenate %61, %62, %63, %64 in 0 : vector<1x8x8xf32>, vector<1x8x8xf32>, vector<1x8x8xf32>, vector<1x8x8xf32> -> vector<4x8x8xf32>
    %66 = vector.shape_cast %23 : vector<8x15xf32> to vector<1x8x15xf32>
    %67 = vector.shape_cast %35 : vector<8x15xf32> to vector<1x8x15xf32>
    %68 = vector.shape_cast %47 : vector<8x15xf32> to vector<1x8x15xf32>
    %69 = vector.shape_cast %59 : vector<8x15xf32> to vector<1x8x15xf32>
    %70 = tpu.concatenate %66, %67, %68, %69 in 0 : vector<1x8x15xf32>, vector<1x8x15xf32>, vector<1x8x15xf32>, vector<1x8x15xf32> -> vector<4x8x15xf32>
    %71 = vector.shape_cast %24 : vector<8x8xf32> to vector<1x8x8xf32>
    %72 = vector.shape_cast %36 : vector<8x8xf32> to vector<1x8x8xf32>
    %73 = vector.shape_cast %48 : vector<8x8xf32> to vector<1x8x8xf32>
    %74 = vector.shape_cast %60 : vector<8x8xf32> to vector<1x8x8xf32>
    %75 = tpu.concatenate %71, %72, %73, %74 in 0 : vector<1x8x8xf32>, vector<1x8x8xf32>, vector<1x8x8xf32>, vector<1x8x8xf32> -> vector<4x8x8xf32>
    %76 = vector.extract_strided_slice %70 {offsets = [0, 0, 7], sizes = [4, 1, 8], strides = [1, 1, 1]} : vector<4x8x15xf32> to vector<4x1x8xf32>
    %77 = vector.shape_cast %76 : vector<4x1x8xf32> to vector<4x8xf32>
    %c0_24 = arith.constant 0 : index
    %c0_25 = arith.constant 0 : index
    %c0_26 = arith.constant 0 : index
    %78 = vector.load %arg13[%c0_24, %c0_25, %c0_26] : memref<4x8x8xf32, #tpu.memory_space<vmem>>, vector<4x1x8xf32>
    %79 = vector.shape_cast %78 : vector<4x1x8xf32> to vector<4x8xf32>
    %80 = vector.shape_cast %77 : vector<4x8xf32> to vector<4x1x8xf32>
    tpu.vector_store %arg13[%c0_24, %c0_25, %c0_26], %80 {strides = array<i32>} : memref<4x8x8xf32, #tpu.memory_space<vmem>>, vector<4x1x8xf32>,
    %81 = vector.extract_strided_slice %70 {offsets = [0, 1, 6], sizes = [4, 1, 8], strides = [1, 1, 1]} : vector<4x8x15xf32> to vector<4x1x8xf32>
    %82 = vector.shape_cast %81 : vector<4x1x8xf32> to vector<4x8xf32>
    %c0_27 = arith.constant 0 : index
    %c1 = arith.constant 1 : index
    %c0_28 = arith.constant 0 : index
    %83 = vector.load %arg13[%c0_27, %c1, %c0_28] : memref<4x8x8xf32, #tpu.memory_space<vmem>>, vector<4x1x8xf32>
    %84 = vector.shape_cast %83 : vector<4x1x8xf32> to vector<4x8xf32>
    %85 = vector.shape_cast %82 : vector<4x8xf32> to vector<4x1x8xf32>
    tpu.vector_store %arg13[%c0_27, %c1, %c0_28], %85 {strides = array<i32>} : memref<4x8x8xf32, #tpu.memory_space<vmem>>, vector<4x1x8xf32>,
    %86 = vector.extract_strided_slice %70 {offsets = [0, 2, 5], sizes = [4, 1, 8], strides = [1, 1, 1]} : vector<4x8x15xf32> to vector<4x1x8xf32>
    %87 = vector.shape_cast %86 : vector<4x1x8xf32> to vector<4x8xf32>
    %c0_29 = arith.constant 0 : index
    %c2 = arith.constant 2 : index
    %c0_30 = arith.constant 0 : index
    %88 = vector.load %arg13[%c0_29, %c2, %c0_30] : memref<4x8x8xf32, #tpu.memory_space<vmem>>, vector<4x1x8xf32>
    %89 = vector.shape_cast %88 : vector<4x1x8xf32> to vector<4x8xf32>
    %90 = vector.shape_cast %87 : vector<4x8xf32> to vector<4x1x8xf32>
    tpu.vector_store %arg13[%c0_29, %c2, %c0_30], %90 {strides = array<i32>} : memref<4x8x8xf32, #tpu.memory_space<vmem>>, vector<4x1x8xf32>,
    %91 = vector.extract_strided_slice %70 {offsets = [0, 3, 4], sizes = [4, 1, 8], strides = [1, 1, 1]} : vector<4x8x15xf32> to vector<4x1x8xf32>
    %92 = vector.shape_cast %91 : vector<4x1x8xf32> to vector<4x8xf32>
    %c0_31 = arith.constant 0 : index
    %c3 = arith.constant 3 : index
    %c0_32 = arith.constant 0 : index
    %93 = vector.load %arg13[%c0_31, %c3, %c0_32] : memref<4x8x8xf32, #tpu.memory_space<vmem>>, vector<4x1x8xf32>
    %94 = vector.shape_cast %93 : vector<4x1x8xf32> to vector<4x8xf32>
    %95 = vector.shape_cast %92 : vector<4x8xf32> to vector<4x1x8xf32>
    tpu.vector_store %arg13[%c0_31, %c3, %c0_32], %95 {strides = array<i32>} : memref<4x8x8xf32, #tpu.memory_space<vmem>>, vector<4x1x8xf32>,
    %96 = vector.extract_strided_slice %70 {offsets = [0, 4, 3], sizes = [4, 1, 8], strides = [1, 1, 1]} : vector<4x8x15xf32> to vector<4x1x8xf32>
    %97 = vector.shape_cast %96 : vector<4x1x8xf32> to vector<4x8xf32>
    %c0_33 = arith.constant 0 : index
    %c4 = arith.constant 4 : index
    %c0_34 = arith.constant 0 : index
    %98 = vector.load %arg13[%c0_33, %c4, %c0_34] : memref<4x8x8xf32, #tpu.memory_space<vmem>>, vector<4x1x8xf32>
    %99 = vector.shape_cast %98 : vector<4x1x8xf32> to vector<4x8xf32>
    %100 = vector.shape_cast %97 : vector<4x8xf32> to vector<4x1x8xf32>
    tpu.vector_store %arg13[%c0_33, %c4, %c0_34], %100 {strides = array<i32>} : memref<4x8x8xf32, #tpu.memory_space<vmem>>, vector<4x1x8xf32>,
    %101 = vector.extract_strided_slice %70 {offsets = [0, 5, 2], sizes = [4, 1, 8], strides = [1, 1, 1]} : vector<4x8x15xf32> to vector<4x1x8xf32>
    %102 = vector.shape_cast %101 : vector<4x1x8xf32> to vector<4x8xf32>
    %c0_35 = arith.constant 0 : index
    %c5 = arith.constant 5 : index
    %c0_36 = arith.constant 0 : index
    %103 = vector.load %arg13[%c0_35, %c5, %c0_36] : memref<4x8x8xf32, #tpu.memory_space<vmem>>, vector<4x1x8xf32>
    %104 = vector.shape_cast %103 : vector<4x1x8xf32> to vector<4x8xf32>
    %105 = vector.shape_cast %102 : vector<4x8xf32> to vector<4x1x8xf32>
    tpu.vector_store %arg13[%c0_35, %c5, %c0_36], %105 {strides = array<i32>} : memref<4x8x8xf32, #tpu.memory_space<vmem>>, vector<4x1x8xf32>,
    %106 = vector.extract_strided_slice %70 {offsets = [0, 6, 1], sizes = [4, 1, 8], strides = [1, 1, 1]} : vector<4x8x15xf32> to vector<4x1x8xf32>
    %107 = vector.shape_cast %106 : vector<4x1x8xf32> to vector<4x8xf32>
    %c0_37 = arith.constant 0 : index
    %c6 = arith.constant 6 : index
    %c0_38 = arith.constant 0 : index
    %108 = vector.load %arg13[%c0_37, %c6, %c0_38] : memref<4x8x8xf32, #tpu.memory_space<vmem>>, vector<4x1x8xf32>
    %109 = vector.shape_cast %108 : vector<4x1x8xf32> to vector<4x8xf32>
    %110 = vector.shape_cast %107 : vector<4x8xf32> to vector<4x1x8xf32>
    tpu.vector_store %arg13[%c0_37, %c6, %c0_38], %110 {strides = array<i32>} : memref<4x8x8xf32, #tpu.memory_space<vmem>>, vector<4x1x8xf32>,
    %111 = vector.extract_strided_slice %70 {offsets = [0, 7, 0], sizes = [4, 1, 8], strides = [1, 1, 1]} : vector<4x8x15xf32> to vector<4x1x8xf32>
    %112 = vector.shape_cast %111 : vector<4x1x8xf32> to vector<4x8xf32>
    %c0_39 = arith.constant 0 : index
    %c7 = arith.constant 7 : index
    %c0_40 = arith.constant 0 : index
    %113 = vector.load %arg13[%c0_39, %c7, %c0_40] : memref<4x8x8xf32, #tpu.memory_space<vmem>>, vector<4x1x8xf32>
    %114 = vector.shape_cast %113 : vector<4x1x8xf32> to vector<4x8xf32>
    %115 = vector.shape_cast %112 : vector<4x8xf32> to vector<4x1x8xf32>
    tpu.vector_store %arg13[%c0_39, %c7, %c0_40], %115 {strides = array<i32>} : memref<4x8x8xf32, #tpu.memory_space<vmem>>, vector<4x1x8xf32>,
    %c0_41 = arith.constant 0 : index
    %c0_42 = arith.constant 0 : index
    %c0_43 = arith.constant 0 : index
    %116 = vector.load %arg13[%c0_41, %c0_42, %c0_43] : memref<4x8x8xf32, #tpu.memory_space<vmem>>, vector<4x8x8xf32>
    %117 = tpu.iota {dimensions = array<i32: 0>} : vector<8x8xi32>
    %118 = tpu.iota {dimensions = array<i32: 1>} : vector<8x8xi32>
    %119 = vector.extract_strided_slice %70 {offsets = [0, 0, 7], sizes = [4, 8, 1], strides = [1, 1, 1]} : vector<4x8x15xf32> to vector<4x8x1xf32>
    %120 = arith.addf %65, %116 : vector<4x8x8xf32>
    %121 = arith.cmpi eq, %117, %118 : vector<8x8xi32>
    %122 = vector.shape_cast %121 : vector<8x8xi1> to vector<1x8x8xi1>
    %cst_44 = arith.constant 0.000000e+00 : f32
    %123 = vector.shape_cast %122 : vector<1x8x8xi1> to vector<1x8x8xi1>
    %124 = vector.broadcast %123 : vector<1x8x8xi1> to vector<4x8x8xi1>
    %125 = vector.shape_cast %119 : vector<4x8x1xf32> to vector<4x8x1xf32>
    %126 = vector.broadcast %125 : vector<4x8x1xf32> to vector<4x8x8xf32>
    %127 = vector.broadcast %cst_44 : f32 to vector<4x8x8xf32>
    %128 = arith.select %124, %126, %127 : vector<4x8x8xi1>, vector<4x8x8xf32>
    %129 = arith.addf %120, %128 : vector<4x8x8xf32>
    %cst_45 = arith.constant dense<0xFF800000> : vector<4x8xf32>
    %130 = vector.multi_reduction <maximumf>, %129, %cst_45 [2] : vector<4x8x8xf32> to vector<4x8xf32>
    %131 = vector.shape_cast %130 : vector<4x8xf32> to vector<4x8x1xf32>
    %132 = vector.broadcast %131 : vector<4x8x1xf32> to vector<4x8x8xf32>
    %133 = arith.subf %129, %132 : vector<4x8x8xf32>
    %134 = math.exp %133 : vector<4x8x8xf32>
    %cst_46 = arith.constant dense<0.000000e+00> : vector<4x8xf32>
    %135 = vector.multi_reduction <add>, %134, %cst_46 [2] : vector<4x8x8xf32> to vector<4x8xf32>
    %136 = vector.shape_cast %135 : vector<4x8xf32> to vector<4x8x1xf32>
    %137 = tpu.reciprocal %136 {approx = true} : vector<4x8x1xf32> -> vector<4x8x1xf32>
    %138 = vector.broadcast %137 : vector<4x8x1xf32> to vector<4x8x8xf32>
    %139 = arith.mulf %134, %138 : vector<4x8x8xf32>
    "tpu.trace_start"() <{level = 10 : i32, message = "hqk,hkd->hqd"}> : () -> ()
    %cst_47 = arith.constant dense<0.000000e+00> : vector<4x8x8xf32>
    %140 = tpu.matmul %139, %75, %cst_47 {dimension_numbers = #tpu.dot_dimension_numbers<[2], [1], [1], [2], [0, 0, 0, 1, 1, 2], [0], [0]>} : vector<4x8x8xf32>, vector<4x8x8xf32>, vector<4x8x8xf32> -> vector<4x8x8xf32>
    %cst_48 = arith.constant 0.000000e+00 : f32
    "tpu.trace_stop"() : () -> ()
    %141 = vector.broadcast %cst_48 : f32 to vector<8x32xf32>
    %c0_49 = arith.constant 0 : index
    %c0_50 = arith.constant 0 : index
    %142 = vector.load %arg9[%c0_49, %c0_50] : memref<1x32xf32, #tpu.memory_space<vmem>>, vector<1x32xf32>
    %143 = vector.broadcast %142 : vector<1x32xf32> to vector<8x32xf32>
    %144 = arith.addf %141, %143 : vector<8x32xf32>
    %c0_51 = arith.constant 0 : index
    %c0_52 = arith.constant 0 : index
    %145 = vector.load %arg8[%c0_51, %c0_52] : memref<32x32xf32, #tpu.memory_space<vmem>>, vector<32x32xf32>
    %146 = vector.extract_strided_slice %140 {offsets = [0, 0, 0], sizes = [1, 8, 8], strides = [1, 1, 1]} : vector<4x8x8xf32> to vector<1x8x8xf32>
    %147 = vector.shape_cast %146 : vector<1x8x8xf32> to vector<8x8xf32>
    %148 = vector.extract_strided_slice %145 {offsets = [0, 0], sizes = [8, 32], strides = [1, 1]} : vector<32x32xf32> to vector<8x32xf32>
    %cst_53 = arith.constant dense<0.000000e+00> : vector<8x32xf32>
    %149 = tpu.matmul %147, %148, %cst_53 {dimension_numbers = #tpu.dot_dimension_numbers<[1], [0], [0], [1], [0, 0, 1, 1], [], []>} : vector<8x8xf32>, vector<8x32xf32>, vector<8x32xf32> -> vector<8x32xf32>
    %150 = arith.addf %144, %149 : vector<8x32xf32>
    %151 = vector.extract_strided_slice %140 {offsets = [1, 0, 0], sizes = [1, 8, 8], strides = [1, 1, 1]} : vector<4x8x8xf32> to vector<1x8x8xf32>
    %152 = vector.shape_cast %151 : vector<1x8x8xf32> to vector<8x8xf32>
    %153 = vector.extract_strided_slice %145 {offsets = [8, 0], sizes = [8, 32], strides = [1, 1]} : vector<32x32xf32> to vector<8x32xf32>
    %cst_54 = arith.constant dense<0.000000e+00> : vector<8x32xf32>
    %154 = tpu.matmul %152, %153, %cst_54 {dimension_numbers = #tpu.dot_dimension_numbers<[1], [0], [0], [1], [0, 0, 1, 1], [], []>} : vector<8x8xf32>, vector<8x32xf32>, vector<8x32xf32> -> vector<8x32xf32>
    %155 = arith.addf %150, %154 : vector<8x32xf32>
    %156 = vector.extract_strided_slice %140 {offsets = [2, 0, 0], sizes = [1, 8, 8], strides = [1, 1, 1]} : vector<4x8x8xf32> to vector<1x8x8xf32>
    %157 = vector.shape_cast %156 : vector<1x8x8xf32> to vector<8x8xf32>
    %158 = vector.extract_strided_slice %145 {offsets = [16, 0], sizes = [8, 32], strides = [1, 1]} : vector<32x32xf32> to vector<8x32xf32>
    %cst_55 = arith.constant dense<0.000000e+00> : vector<8x32xf32>
    %159 = tpu.matmul %157, %158, %cst_55 {dimension_numbers = #tpu.dot_dimension_numbers<[1], [0], [0], [1], [0, 0, 1, 1], [], []>} : vector<8x8xf32>, vector<8x32xf32>, vector<8x32xf32> -> vector<8x32xf32>
    %160 = arith.addf %155, %159 : vector<8x32xf32>
    %161 = vector.extract_strided_slice %140 {offsets = [3, 0, 0], sizes = [1, 8, 8], strides = [1, 1, 1]} : vector<4x8x8xf32> to vector<1x8x8xf32>
    %162 = vector.shape_cast %161 : vector<1x8x8xf32> to vector<8x8xf32>
    %163 = vector.extract_strided_slice %145 {offsets = [24, 0], sizes = [8, 32], strides = [1, 1]} : vector<32x32xf32> to vector<8x32xf32>
    %cst_56 = arith.constant dense<0.000000e+00> : vector<8x32xf32>
    %164 = tpu.matmul %162, %163, %cst_56 {dimension_numbers = #tpu.dot_dimension_numbers<[1], [0], [0], [1], [0, 0, 1, 1], [], []>} : vector<8x8xf32>, vector<8x32xf32>, vector<8x32xf32> -> vector<8x32xf32>
    %165 = arith.addf %160, %164 : vector<8x32xf32>
    %166 = arith.addf %1, %165 : vector<8x32xf32>
    %cst_57 = arith.constant dense<0.000000e+00> : vector<8xf32>
    %167 = vector.multi_reduction <add>, %166, %cst_57 [1] : vector<8x32xf32> to vector<8xf32>
    %168 = vector.shape_cast %167 : vector<8xf32> to vector<8x1xf32>
    %cst_58 = arith.constant 3.200000e+01 : f32
    %169 = vector.broadcast %cst_58 : f32 to vector<8x1xf32>
    %170 = arith.divf %168, %169 : vector<8x1xf32>
    %171 = vector.broadcast %170 : vector<8x1xf32> to vector<8x32xf32>
    %172 = arith.subf %166, %171 : vector<8x32xf32>
    %173 = arith.mulf %172, %172 : vector<8x32xf32>
    %cst_59 = arith.constant dense<0.000000e+00> : vector<8xf32>
    %174 = vector.multi_reduction <add>, %173, %cst_59 [1] : vector<8x32xf32> to vector<8xf32>
    %175 = vector.shape_cast %174 : vector<8xf32> to vector<8x1xf32>
    %cst_60 = arith.constant 3.200000e+01 : f32
    %176 = vector.broadcast %cst_60 : f32 to vector<8x1xf32>
    %177 = arith.divf %175, %176 : vector<8x1xf32>
    %178 = vector.broadcast %170 : vector<8x1xf32> to vector<8x32xf32>
    %179 = arith.subf %166, %178 : vector<8x32xf32>
    %cst_61 = arith.constant 9.99999974E-6 : f32
    %180 = vector.broadcast %cst_61 : f32 to vector<8x1xf32>
    %181 = arith.addf %177, %180 : vector<8x1xf32>
    %182 = math.rsqrt %181 : vector<8x1xf32>
    %183 = vector.broadcast %182 : vector<8x1xf32> to vector<8x32xf32>
    %184 = arith.mulf %179, %183 : vector<8x32xf32>
    %c0_62 = arith.constant 0 : index
    %c0_63 = arith.constant 0 : index
    %185 = vector.load %arg10[%c0_62, %c0_63] : memref<1x32xf32, #tpu.memory_space<vmem>>, vector<1x32xf32>
    %186 = vector.broadcast %185 : vector<1x32xf32> to vector<8x32xf32>
    %187 = arith.mulf %184, %186 : vector<8x32xf32>
    %c0_64 = arith.constant 0 : index
    %c0_65 = arith.constant 0 : index
    %188 = vector.load %arg11[%c0_64, %c0_65] : memref<1x32xf32, #tpu.memory_space<vmem>>, vector<1x32xf32>
    %189 = vector.broadcast %188 : vector<1x32xf32> to vector<8x32xf32>
    %190 = arith.addf %187, %189 : vector<8x32xf32>
    %c0_66 = arith.constant 0 : index
    %c0_67 = arith.constant 0 : index
    %c0_68 = arith.constant 0 : index
    %191 = vector.load %arg12[%c0_66, %c0_67, %c0_68] : memref<1x8x32xf32, #tpu.memory_space<vmem>>, vector<1x8x32xf32>
    %192 = vector.shape_cast %191 : vector<1x8x32xf32> to vector<8x32xf32>
    %193 = vector.shape_cast %190 : vector<8x32xf32> to vector<1x8x32xf32>
    tpu.vector_store %arg12[%c0_66, %c0_67, %c0_68], %193 {strides = array<i32>} : memref<1x8x32xf32, #tpu.memory_space<vmem>>, vector<1x8x32xf32>,
    return
  }
  func.func @transform_0(%arg0: i32) -> (i32, i32, i32) {
    %c0_i32 = arith.constant 0 : i32
    %c0_i32_0 = arith.constant 0 : i32
    %c0_i32_1 = arith.constant 0 : i32
    return %arg0, %c0_i32, %c0_i32_0 : i32, i32, i32
  }
  func.func @transform_1(%arg0: i32) -> (i32, i32, i32) {
    %c0_i32 = arith.constant 0 : i32
    %c0_i32_0 = arith.constant 0 : i32
    %c0_i32_1 = arith.constant 0 : i32
    return %arg0, %c0_i32, %c0_i32_0 : i32, i32, i32
  }
  func.func @transform_2(%arg0: i32) -> (i32, i32) {
    %c0_i32 = arith.constant 0 : i32
    %c0_i32_0 = arith.constant 0 : i32
    %c0_i32_1 = arith.constant 0 : i32
    return %c0_i32, %c0_i32_0 : i32, i32
  }
  func.func @transform_3(%arg0: i32) -> (i32, i32) {
    %c0_i32 = arith.constant 0 : i32
    %c0_i32_0 = arith.constant 0 : i32
    %c0_i32_1 = arith.constant 0 : i32
    return %c0_i32, %c0_i32_0 : i32, i32
  }
  func.func @transform_4(%arg0: i32) -> (i32, i32) {
    %c0_i32 = arith.constant 0 : i32
    %c0_i32_0 = arith.constant 0 : i32
    %c0_i32_1 = arith.constant 0 : i32
    return %c0_i32, %c0_i32_0 : i32, i32
  }
  func.func @transform_5(%arg0: i32) -> (i32, i32) {
    %c0_i32 = arith.constant 0 : i32
    %c0_i32_0 = arith.constant 0 : i32
    %c0_i32_1 = arith.constant 0 : i32
    return %c0_i32, %c0_i32_0 : i32, i32
  }
  func.func @transform_6(%arg0: i32) -> (i32, i32) {
    %c0_i32 = arith.constant 0 : i32
    %c0_i32_0 = arith.constant 0 : i32
    %c0_i32_1 = arith.constant 0 : i32
    return %c0_i32, %c0_i32_0 : i32, i32
  }
  func.func @transform_7(%arg0: i32) -> (i32, i32) {
    %c0_i32 = arith.constant 0 : i32
    %c0_i32_0 = arith.constant 0 : i32
    %c0_i32_1 = arith.constant 0 : i32
    return %c0_i32, %c0_i32_0 : i32, i32
  }
  func.func @transform_8(%arg0: i32) -> (i32, i32) {
    %c0_i32 = arith.constant 0 : i32
    %c0_i32_0 = arith.constant 0 : i32
    %c0_i32_1 = arith.constant 0 : i32
    return %c0_i32, %c0_i32_0 : i32, i32
  }
  func.func @transform_9(%arg0: i32) -> (i32, i32) {
    %c0_i32 = arith.constant 0 : i32
    %c0_i32_0 = arith.constant 0 : i32
    %c0_i32_1 = arith.constant 0 : i32
    return %c0_i32, %c0_i32_0 : i32, i32
  }
  func.func @transform_10(%arg0: i32) -> (i32, i32) {
    %c0_i32 = arith.constant 0 : i32
    %c0_i32_0 = arith.constant 0 : i32
    %c0_i32_1 = arith.constant 0 : i32
    return %c0_i32, %c0_i32_0 : i32, i32
  }
  func.func @transform_11(%arg0: i32) -> (i32, i32, i32) {
    %c0_i32 = arith.constant 0 : i32
    %c0_i32_0 = arith.constant 0 : i32
    %c0_i32_1 = arith.constant 0 : i32
    return %arg0, %c0_i32, %c0_i32_0 : i32, i32, i32
  }
}

</mosaic_0001>

<bundles_post_ra>
// kernel: tpu_custom_call.1
= control target key start
LH: loop header
LB: loop body
LE: loop exit
PB: predicated region body
PF: predicated region fallthrough
CT: control target
= control target key end

     0   :  { %s3496_s0 = inlined_call_operand.hbm [shape: f32[2,8,32], index: 0, kind: input, shape index: {}]   ;;  %s3497_s1 = inlined_call_operand.hbm [shape: f32[2,8,32], index: 1, kind: input, shape index: {}]   ;;  %s3498_s2 = inlined_call_operand.hbm [shape: f32[15,32], index: 2, kind: input, shape index: {}]   ;;  %s3499_s3 = inlined_call_operand.hbm [shape: f32[32,32], index: 3, kind: input, shape index: {}]   ;;  %s3500_s4 = inlined_call_operand.hbm [shape: f32[32,64], index: 4, kind: input, shape index: {}]   ;;  %s3501_s5 = inlined_call_operand.vmem [shape: f32[1,32], index: 5, kind: input, shape index: {}]   ;;  %s3502_s6 = inlined_call_operand.vmem [shape: f32[1,32], index: 6, kind: input, shape index: {}]   ;;  %s3503_s7 = inlined_call_operand.hbm [shape: f32[32,32], index: 7, kind: input, shape index: {}]   ;;  %s3504_s8 = inlined_call_operand.vmem [shape: f32[1,32], index: 8, kind: input, shape index: {}]   ;;  %s3505_s9 = inlined_call_operand.vmem [shape: f32[1,32], index: 9, kind: input, shape index: {}]   ;;  %s3506_s10 = inlined_call_operand.vmem [shape: f32[1,32], index: 10, kind: input, shape index: {}]   ;;  %s3507_s11 = inlined_call_operand.hbm [shape: f32[2,8,32], index: 11, kind: output, shape index: {}]  }
   0x1   :  { %3516 = sst [smem:[#allocation25_spill]] %s3498_s2 }
   0x2   :  { %3517 = sst [smem:[#allocation26_spill]] %s3499_s3 }
   0x3   :  { %3518 = sst [smem:[#allocation27_spill]] %s3500_s4 }
   0x4   :  { %3519 = sst [smem:[#allocation28_spill]] %s3503_s7 }
   0x5   :  { %16 = vsyncpa [#allocation4], 0 }
   0x6   :  { %18 = vsyncpa [#allocation4 + $0x1], 0 }
   0x7   :  { %19 = vsyncpa [#allocation7], 0 }
   0x8   :  { %21 = vsyncpa [#allocation7 + $0x1], 0 }
   0x9   :  { %22 = vsyncpa [#allocation10], 0 }
   0xa   :  { %23 = vsyncpa [#allocation13], 0 }
   0xb   :  { %24 = vsyncpa [#allocation5], 0 }
   0xc   :  { %26 = vsyncpa [#allocation5 + $0x1], 0  ;;  %s2975_s17 = smov 0   ;;  %s2977_s18 = smov 0  }
   0xd   :  { %s2979_s19 = smov 0   ;;  %s2981_s20 = smov 0  }
   0xe LB: > { %3520 = sst [smem:[#allocation21_spill]] %s2886_s19  ;;  %s2892_s21 = smov [#allocation8]   ;;  %s2890_s20 = sphi %s2981_s20, %s3547_s20   ;;  %s2886_s19 = sphi %s2979_s19, %s3549_s19   ;;  %s2882_s18 = sphi %s2977_s18, %s3551_s18   ;;  %s2878_s17 = sphi %s2975_s17, %s3550_s17  }
   0xf   : > { %s316_s22 = sshll.u32 %s2892_s21, 4  ;;  %s2996_s23 = sadd.s32 4294967295, %s2890_s20   ;;  %s317_s22 = int_to_ptr.vmem [resolvable:$true] %s316_s22 }
  0x10   : > { %p2309_p0 = scmp.ge.s32.totalorder %s2890_s20, 1  ;;  %p3512_p1 = scmp.eq.s32.totalorder %s2996_s23, 0 }
  0x11   : > { %p304_p2 = scmp.lt.s32.totalorder %s2890_s20, 3  ;;  %s2893_s25 = smov [#allocation9]  }
  0x12   : > { %s329_s26 = sshll.u32 %s2893_s25, 4  ;;  %s2894_s28 = smov [#allocation11]   ;;  %s3014_s26 = int_to_ptr.vmem [resolvable:$true] %s329_s26 }
  0x13   : > { %p3001_p3 = pnand %p2309_p0, %p304_p2  ;;  %s342_s29 = sshll.u32 %s2894_s28, 4  ;;  %s3016_s29 = int_to_ptr.vmem [resolvable:$true] %s342_s29 }
  0x14   : > { %s2661_s30 = scalar_lea.vmem %s317_s22, 256  ;;  %p2669_p11 = scmp.lt.s32.totalorder %s317_s22, %s317_s22 }
  0x15   : > { %s3521_s24 = scalar_select %p3001_p3, 1, 0 }
  0x16   : > { %p2544_p5 = pneg %p3001_p3  ;;  %p2662_p8 = scmp.ne.s32.totalorder %s317_s22, %s2661_s30 }
  0x17   : > { %p2670_p12 = scmp.lt.s32.totalorder %s2661_s30, %s2661_s30 }
  0x18   : > { %p3010_p6 = pnand %p2544_p5, %p3512_p1 }
  0x19   : > { %p2671_p13 = por %p2670_p12, %p2669_p11 }
  0x1a   : > { %p2652_p7 = pneg %p3010_p6 }
  0x1c   : > { %p2664_p9 = pnand %p2662_p8, %p2652_p7 }
  0x1e   : > { %p2665_p10 = pneg %p2664_p9 }
  0x20   : > { %p2672_p0 = pnand %p2671_p13, %p2665_p10 }
  0x22   : > { %2675 = shalt.err (!%p2672_p0)
}
  0x23   : > { %s2895_s12 = smov 128   ;;  %s2896_s13 = smov 8  }
  0x24   : > { %s3523_s2 = sld [smem:[#allocation25_spill]]  ;;  %s2687_s16 = scalar_lea.vmem %s3014_s26, 512 }
  0x25   : > { %p2688_p2 = scmp.ne.s32.totalorder %s3014_s26, %s2687_s16  ;;  %p2695_p9 = scmp.lt.s32.totalorder %s3014_s26, %s3014_s26 }
  0x26   : > { %p2696_p10 = scmp.lt.s32.totalorder %s2687_s16, %s2687_s16 }
  0x27   : > { %p2690_p5 = pnand %p2688_p2, %p2652_p7 }
  0x28   : > { %p2697_p11 = por %p2696_p10, %p2695_p9 }
  0x29   : > { %p2691_p8 = pneg %p2690_p5 }
  0x2a   : > { %2547 = dma.hbm_to_vmem [thread:$0]  (!%p3010_p6), %s3523_s2, 256, %s317_s22, [#allocation7], %s2895_s12, %s2895_s12, %s2896_s13  }
  0x2b   : > { %p2698_p12 = pnand %p2697_p11, %p2691_p8 }
  0x2d   : > { %2701 = shalt.err (!%p2698_p12)
}
  0x2e   : > { %s3524_s3 = sld [smem:[#allocation26_spill]]  ;;  %s2713_s25 = scalar_lea.vmem %s3016_s29, 512 }
  0x2f   : > { %p2714_p13 = scmp.ne.s32.totalorder %s3016_s29, %s2713_s25  ;;  %p2721_p5 = scmp.lt.s32.totalorder %s3016_s29, %s3016_s29 }
  0x30   : > { %p2722_p8 = scmp.lt.s32.totalorder %s2713_s25, %s2713_s25 }
  0x31   : > { %p2716_p0 = pnand %p2714_p13, %p2652_p7 }
  0x32   : > { %p2723_p9 = por %p2722_p8, %p2721_p5 }
  0x33   : > { %p2717_p2 = pneg %p2716_p0 }
  0x34   : > { %2550 = dma.hbm_to_vmem [thread:$0]  (!%p3010_p6), %s3524_s3, 512, %s3014_s26, [#allocation10], %s2895_s12, %s2895_s12, %s2896_s13  }
  0x35   : > { %p2724_p10 = pnand %p2723_p9, %p2717_p2 }
  0x37   : > { %2727 = shalt.err (!%p2724_p10)
}
  0x38   : > { %s3525_s4 = sld [smem:[#allocation27_spill]]  ;;  %s2897_s30 = smov [#allocation12]  }
  0x39   : > { %s361_s14 = sshll.u32 %s2897_s30, 4  ;;  %s362_s14 = int_to_ptr.vmem [resolvable:$true] %s361_s14 }
  0x3a   : > { %s2739_s15 = scalar_lea.vmem %s362_s14, 512  ;;  %p2747_p0 = scmp.lt.s32.totalorder %s362_s14, %s362_s14 }
  0x3b   : > { %p2740_p11 = scmp.ne.s32.totalorder %s362_s14, %s2739_s15  ;;  %p2748_p2 = scmp.lt.s32.totalorder %s2739_s15, %s2739_s15 }
  0x3d   : > { %p2742_p12 = pnand %p2740_p11, %p2652_p7  ;;  %p2749_p5 = por %p2748_p2, %p2747_p0 }
  0x3e   : > { %2553 = dma.hbm_to_vmem [thread:$0]  (!%p3010_p6), %s3525_s4, 512, %s3016_s29, [#allocation10], %s2895_s12, %s2895_s12, %s2896_s13  }
  0x3f   : > { %p2743_p13 = pneg %p2742_p12 }
  0x41   : > { %p2750_p8 = pnand %p2749_p5, %p2743_p13 }
  0x43   : > { %2753 = shalt.err (!%p2750_p8)
}
  0x44   : > { %s3526_s7 = sld [smem:[#allocation28_spill]]  ;;  %s2308_s27 = sadd.s32 4294967294, %s2890_s20  }
  0x45   : > { %s3076_s21 = sadd.s32 1, %s2890_s20   ;;  %s39_s25 = sadd.s32 1, %s2886_s19 }
  0x46   : > { %3527 = sst [smem:[#allocation22_spill]] %s3076_s21  ;;  %s36_s22 = ssub.s32 %s2890_s20, %s3076_s21 }
  0x47   : > { %p37_p7 = scmp.eq.s32.totalorder %s36_s22, 0  ;;  %p46_p9 = scmp.ne.s32.totalorder %s2886_s19, %s2882_s18 }
  0x48   : > { %p47_p10 = scmp.eq.s32.totalorder %s2890_s20, 0  ;;  %p52_p11 = scmp.ne.s32.totalorder %s2882_s18, %s2878_s17 }
  0x49   : > { %s3087_s28 = scalar_select %p37_p7, %s2886_s19, %s39_s25  }
  0x4a   : > { %2556 = dma.hbm_to_vmem [thread:$0]  (!%p3010_p6), %s3526_s7, 512, %s362_s14, [#allocation13], %s2895_s12, %s2895_s12, %s2896_s13  }
  0x4b   : > { %3528 = sst [smem:[#allocation23_spill]] %s3087_s28  ;;  %p3089_p12 = por %p47_p10, %p46_p9 }
  0x4c   : > { %p3095_p6 = por %p3512_p1, %p52_p11  ;;  %p291_p13 = scmp.eq.s32.totalorder %s2996_s23, 1 }
  0x4d   : > { %p297_p0 = scmp.eq.s32.totalorder %s2308_s27, 1  ;;  %p2572_p2 = scmp.lt.s32.totalorder %s2890_s20, 2 }
  0x4e   : > { %s3530_s12 = scalar_select %p3095_p6, 1, 0 }
  0x4f   : > { %s384_s13 = sand.u32 1, %s2886_s19   ;;  %p3102_p5 = por %p291_p13, %p46_p9 }
  0x50   : > { %p3106_p8 = por %p297_p0, %p52_p11  ;;  %s3110_s15 = sshll.u32 %s384_s13, 3 }
  0x51   : > { %s3531_s30 = scalar_select %p3102_p5, 1, 0 }
  0x52   : > { %s3532_s14 = scalar_select %p3106_p8, 1, 0 }
  0x53   : > { %s2316_s29 = sshll.u32 %s2890_s20, 7  ;;  %s388_s27 = scalar_lea.vmem [#allocation3], %s3110_s15 }
  0x54   : > { %3533 = sst [smem:[#allocation24_spill]] %s3532_s14  ;;  %s3116_s25 = scalar_lea.hbm %s3496_s0, %s2316_s29 }
  0x55   : > { %s395_s2 = sshll.u32 %s388_s27, 4  ;;  %p3123_p7 = pnand %p2572_p2, %p3089_p12  ;;  %s3119_s2 = int_to_ptr.vmem [resolvable:$true] %s395_s2 }
  0x56   : > { %s3130_s16 = scalar_lea.hbm %s3497_s1, %s2316_s29  ;;  %s402_s22 = sand.u32 1, %s2890_s20  }
  0x57   : > { %s385_s28 = scalar_lea.sflag [#allocation4], %s384_s13  ;;  %s2754_s19 = scalar_lea.hbm %s3116_s25, 128 }
  0x58   : > { %p2755_p9 = scmp.ne.s32.totalorder %s3116_s25, %s2754_s19  ;;  %p2756_p10 = pneg %p3123_p7 }
  0x59   : > { %s2759_s21 = scalar_lea.hbm %s3496_s0, 256  ;;  %p2760_p13 = scmp.lt.s32.totalorder %s3116_s25, %s3496_s0 }
  0x5a   : > { %p2757_p11 = pnand %p2756_p10, %p2755_p9  ;;  %p2761_p0 = scmp.lt.s32.totalorder %s2759_s21, %s2754_s19 }
  0x5c   : > { %p2758_p12 = pneg %p2757_p11  ;;  %p2762_p2 = por %p2761_p0, %p2760_p13 }
  0x5e   : > { %p2763_p4 = pnand %p2762_p2, %p2758_p12 }
  0x60   : > { %2766 = shalt.err (!%p2763_p4)
}
  0x61   : > { %s2767_s7 = scalar_lea.vmem %s3119_s2, 128  ;;  %s2898_s13 = smov [#allocation3]  }
  0x62   : > { %p2768_p1 = scmp.ne.s32.totalorder %s3119_s2, %s2767_s7  ;;  %s2772_s29 = sshll.u32 %s2898_s13, 4  ;;  %s2773_s29 = int_to_ptr.vmem [resolvable:$false] %s2772_s29 }
  0x63   : > { %s2774_s26 = scalar_lea.vmem %s2773_s29, 256  ;;  %p2775_p8 = scmp.lt.s32.totalorder %s3119_s2, %s2773_s29 }
  0x64   : > { %p2770_p9 = pnand %p2768_p1, %p2756_p10  ;;  %p2776_p5 = scmp.lt.s32.totalorder %s2774_s26, %s2767_s7 }
  0x66   : > { %p2771_p11 = pneg %p2770_p9  ;;  %p2777_p6 = por %p2776_p5, %p2775_p8 }
  0x68   : > { %p2778_p13 = pnand %p2777_p6, %p2771_p11 }
  0x6a   : > { %2781 = shalt.err (!%p2778_p13)
}
  0x6b   : > { %2560 = dma.hbm_to_vmem [thread:$0]  (!%p3123_p7), %s3116_s25, 128, %s3119_s2, %s385_s28  }
  0x6c   : > { %s406_s19 = scalar_lea.vmem [#allocation6], %s3110_s15  ;;  %s403_s14 = scalar_lea.sflag [#allocation7], %s402_s22 }
  0x6d   : > { %s413_s21 = sshll.u32 %s406_s19, 4  ;;  %s2782_s27 = scalar_lea.hbm %s3130_s16, 128  ;;  %s414_s21 = int_to_ptr.vmem [resolvable:$true] %s413_s21 }
  0x6e   : > { %p2783_p1 = scmp.ne.s32.totalorder %s3130_s16, %s2782_s27  ;;  %s2787_s13 = scalar_lea.hbm %s3497_s1, 256 }
  0x6f   : > { %p2788_p5 = scmp.lt.s32.totalorder %s3130_s16, %s3497_s1  ;;  %p2789_p8 = scmp.lt.s32.totalorder %s2787_s13, %s2782_s27 }
  0x70   : > { %p2785_p4 = pnand %p2783_p1, %p2756_p10 }
  0x71   : > { %p2790_p12 = por %p2789_p8, %p2788_p5 }
  0x72   : > { %p2786_p6 = pneg %p2785_p4 }
  0x74   : > { %p2791_p0 = pnand %p2790_p12, %p2786_p6 }
  0x76   : > { %2794 = shalt.err (!%p2791_p0)
}
  0x77   : > { %s2795_s2 = scalar_lea.vmem %s414_s21, 128  ;;  %s2899_s28 = smov [#allocation6]  }
  0x78   : > { %p2796_p2 = scmp.ne.s32.totalorder %s414_s21, %s2795_s2  ;;  %s2800_s15 = sshll.u32 %s2899_s28, 4  ;;  %s2801_s15 = int_to_ptr.vmem [resolvable:$false] %s2800_s15 }
  0x79   : > { %s2802_s25 = scalar_lea.vmem %s2801_s15, 256  ;;  %p2803_p13 = scmp.lt.s32.totalorder %s414_s21, %s2801_s15 }
  0x7a   : > { %p2798_p9 = pnand %p2796_p2, %p2756_p10  ;;  %p2804_p1 = scmp.lt.s32.totalorder %s2802_s25, %s2795_s2 }
  0x7c   : > { %p2799_p11 = pneg %p2798_p9  ;;  %p2805_p4 = por %p2804_p1, %p2803_p13 }
  0x7e   : > { %p2806_p3 = pnand %p2805_p4, %p2799_p11 }
  0x80   : > { %2809 = shalt.err (!%p2806_p3)
}
  0x81   : > { %2563 = dma.hbm_to_vmem [thread:$0]  (!%p3123_p7), %s3130_s16, 128, %s414_s21, %s403_s14  }
  0x82   : > { %p3535_p6 = scmp.ne.s32.totalorder %s3521_s24, 0 }
  0x83   : > { %s3181_s22 = sand.u32 (!%p3535_p6), 1, %s2882_s18   ;;  %p3536_p10 = scmp.ne.s32.totalorder (!%p3535_p6), %s3530_s12, 0 }
  0x84   : > { %422 = sbr.rel (%p3535_p6) target bundleno = 1876 (0x754), region = 64  ;;  %s3184_s19 = sshll.u32 (!%p3535_p6), %s3181_s22, 3 }
  0x85   : > { %s425_s27 = scalar_lea.sflag (!%p3535_p6), [#allocation4], %s3181_s22  ;;  %s428_s4 = scalar_lea.vmem (!%p3535_p6), [#allocation3], %s3184_s19 }
  0x89   : > { %2853 = dma.done.wait (%p3536_p10), %s425_s27, 128  }
  0x8a   : > { %2855 = vsyncadd (%p3536_p10), %s425_s27, 4294967168  ;;  %s433_s3 = sand.u32 1, %s2996_s23   ;;  %s437_s16 = scalar_lea.vmem [#allocation6], %s3184_s19 }
  0x8b   : > { %s434_s24 = scalar_lea.sflag [#allocation7], %s433_s3 }
  0x8c   : > { %2857 = dma.done.wait (%p3536_p10), %s434_s24, 128  }
  0x8d   : > { %2859 = vsyncadd (%p3536_p10), %s434_s24, 4294967168  ;;  %p3537_p3 = scmp.eq.s32.totalorder %s2996_s23, 0 }
  0x8f   : > { %2861 = dma.done.wait (%p3537_p3), [#allocation7], 256   ;;  %p3538_p7 = pmov %p3537_p3 }
  0x90   : > { %p3539_p5 = pmov %p3537_p3 }
  0x91   : > { %2863 = vsyncadd (%p3538_p7), [#allocation7], 4294967040 }
  0x92   : > { %2865 = dma.done.wait (%p3539_p5), [#allocation10], 1024   ;;  %p3540_p8 = pmov %p3537_p3 }
  0x93   : > { %p3541_p12 = pmov %p3537_p3 }
  0x94   : > { %2867 = vsyncadd (%p3540_p8), [#allocation10], 4294966272 }
  0x95   : > { %2869 = dma.done.wait (%p3541_p12), [#allocation13], 512   ;;  %p3542_p0 = pmov %p3537_p3 }
  0x96   : > { %v2900_v0 = vmov 0.0   ;;  %vm2901_vm0 = vmmov 0   ;;  %v504_v1 = vld [vmem:[#allocation9 + $0x18] sm:$0xff]  ;;  %v503_v3 = vld [vmem:[#allocation9 + $0x10] sm:$0xff]  ;;  %v502_v5 = vld [vmem:[#allocation9 + $0x8] sm:$0xff]  ;;  %vm505_vm1 = vcmask 261120   ;;  %v1440_v60 = vlaneseq }
  0x97   : > { %2871 = vsyncadd (%p3542_p0), [#allocation13], 4294966784  ;;  %2412 = vmatprep.subr.mxu0 %v2900_v0  ;;  %2423 = vmatprep.subr.mxu1 %v2900_v0  ;;  %v582_v2 = vld [vmem:[#allocation11 + $0x18] sm:$0xff]  ;;  %v581_v4 = vld [vmem:[#allocation11 + $0x10] sm:$0xff]  ;;  %vm672_vm2 = vcmask 64512   ;;  %s2902_s12 = smov 120  }
  0x98   : > { %2420 = vmatprep.mubr.msk.f32.mxu0 %vm2901_vm0, %v2900_v0  ;;  %2431 = vmatprep.mubr.msk.f32.mxu1 %vm2901_vm0, %v2900_v0  ;;  %v580_v6 = vld [vmem:[#allocation11 + $0x8] sm:$0xff]  ;;  %v501_v7 = vld [vmem:[#allocation9] sm:$0xff]  ;;  %v3222_v9 = vld [vmem:[%s428_s4] sm:$0xff]  ;;  %s2903_s29 = smov 112   ;;  %s2904_s26 = smov 104   ;;  %v2905_v21 = vmov 7  }
  0x99   : > { %2413 = vmatpush3.msra.mxu0 %v504_v1  ;;  %2424 = vmatpush3.msra.mxu1 %v582_v2  ;;  %v579_v8 = vld [vmem:[#allocation11] sm:$0xff]  ;;  %v500_v11 = vld [vmem:[#allocation8 + $0x8] sm:$0x7f]  ;;  %v499_v12 = vld [vmem:[#allocation8] sm:$0xff]  ;;  %vm1431_vm3 = vcmask 64519   ;;  %s2906_s2 = smov 121  }
  0x9a   : > { %2414 = vmatprep.subr.mxu0 %v2900_v0  ;;  %2425 = vmatprep.subr.mxu1 %v2900_v0  ;;  %v498_v10 = vld [vmem:[%s437_s16] sm:$0xff]  ;;  %v2329_v13 = vld [vmem:[%s3501_s5] ss:$0 sm:$0xff]  ;;  %s2907_s28 = smov 122   ;;  %s2908_s15 = smov 123   ;;  %vm1324_vm4 = vcmask 57344  }
  0x9b   : > { %2415 = vmatpush3.msra.mxu0 %v503_v3  ;;  %2426 = vmatpush3.msra.mxu1 %v581_v4  ;;  %v2330_v14 = vld [vmem:[%s3502_s6] ss:$0 sm:$0xff]  ;;  %s2909_s25 = smov 124   ;;  %s2910_s27 = smov 125   ;;  %vm1341_vm5 = vcmask 58369   ;;  %vm1358_vm6 = vcmask 59394  }
  0x9c   : > { %2416 = vmatprep.subr.mxu0 %v2900_v0  ;;  %2427 = vmatprep.subr.mxu1 %v2900_v0  ;;  %s2911_s4 = smov 126   ;;  %s2912_s3 = smov 127   ;;  %vm1375_vm7 = vcmask 60419   ;;  %vm1392_vm8 = vcmask 61444   ;;  %vm1409_vm9 = vcmask 62469   ;;  %vm1426_vm10 = vcmask 63494  }
  0x9d   : > { %2417 = vmatpush3.msra.mxu0 %v502_v5  ;;  %2428 = vmatpush3.msra.mxu1 %v580_v6  ;;  %v3358_v61 = vshrl.u32 %v1440_v60, 7  ;;  %v3360_v62 = vand.u32 127, %v1440_v60  ;;  %s2913_s24 = smov 96   ;;  %p3543_p9 = scmp.ne.s32.totalorder %s3531_s30, 0 }
  0x9e   : > { %2418 = vmatprep.subr.mxu0 %v2900_v0  ;;  %2429 = vmatprep.subr.mxu1 %v2900_v0 }
  0x9f   : > { %2419 = vmatpush3.msra.mxu0 %v501_v7  ;;  %2430 = vmatpush3.msra.mxu1 %v579_v8  ;;  %vm1448_vm11 = vcmp.eq.s32.totalorder %v3358_v61, %v3360_v62 }
  0xa0   : > { %2421 = vmatmul.mubr.msk.f32.vlgmr.msra.gmra.mxu0 %vm505_vm1, %v3222_v9  ;;  %2432 = vmatmul.mubr.msk.f32.vlgmr.msra.gmra.mxu1 %vm505_vm1, %v498_v10 }
  0xa1   : > { %2439 = vmatprep.subr.mxu1 %v2900_v0  ;;  %910 = vrot.lane.b32.xlu1 %v500_v11, %s2902_s12 }
  0xa2   : > { %2440 = vmatpush3.xpose.msk.msra.mxu1 %vm672_vm2, %v500_v11  ;;  %2434 = vmatprep.subr.mxu0 %v2900_v0 }
  0xa3   : > { %2441 = vmatprep.subr.mxu1 %v2900_v0  ;;  %2443 = vmatprep.mubr.msk.f32.mxu1 %vm2901_vm0, %v2900_v0 }
  0xa4   : > { %2436 = vmatprep.mubr.msk.f32.mxu0 %vm2901_vm0, %v2900_v0  ;;  %2630 = vset.pattern.permute.xlu1 %v2905_v21 }
  0xa5   : > { %908 = vrot.lane.b32.xlu1 %v499_v12, %s2902_s12  ;;  %2631 = vset.pattern.permute.xlu0 %v2905_v21 }
  0xa6   : > { %2442 = vmatpush3.xpose.msk.msra.mxu1 %vm672_vm2, %v499_v12 }
  0xa7   : > { %2458 = vmatprep.subr.mxu1 %v2900_v0 }
 0x113   : > { %v911_v22 = vpop.permute.xlu1 %910 }
 0x117   : > { %v909_v23 = vpop.permute.xlu1 %908 }
 0x160   : > { %v575_v15 = vpop.f32.mrf.mxu0  ;;  %v3249_v16 = vpop.f32.mrf.mxu1 }
 0x161   : > { %v664_v17 = vadd.f32 %v2329_v13, %v575_v15  ;;  %v671_v18 = vadd.f32 %v2330_v14, %v575_v15  ;;  %830 = vrot.lane.b32.xlu0 %v3249_v16, %s2902_s12  ;;  %2435 = vmatpush3.xpose.msk.msra.mxu0 %vm672_vm2, %v3249_v16 }
 0x162   : > { %v2433_v19 = vpop.f32.mrf.mxu1  ;;  %v2422_v20 = vpop.f32.mrf.mxu0  ;;  %2446 = vmatprep.subr.mxu0 %v2900_v0 }
 0x163   : > { %906 = vrot.lane.b32.xlu1 %v671_v18, %s2902_s12  ;;  %2444 = vmatmul.mubr.msk.f32.vlgmr.msra.gmra.mxu1 %vm672_vm2, %v671_v18 }
 0x164   : > { %2437 = vmatmul.mubr.msk.f32.vlgmr.msra.gmra.mxu0 %vm672_vm2, %v664_v17  ;;  %2460 = vmatprep.mubr.msk.f32.mxu1 %vm2901_vm0, %v2900_v0 }
 0x165   : > { %990 = vrot.lane.b32.xlu0 %v3249_v16, %s2903_s29  ;;  %2448 = vmatprep.mubr.msk.f32.mxu0 %vm2901_vm0, %v2900_v0 }
 0x167   : > { %988 = vrot.lane.b32.xlu1 %v664_v17, %s2903_s29 }
 0x169   : > { %828 = vrot.lane.b32.xlu0 %v664_v17, %s2902_s12 }
 0x16b   : > { %1148 = vrot.lane.b32.xlu1 %v664_v17, %s2904_s26 }
 0x16d   : > { %1150 = vrot.lane.b32.xlu0 %v3249_v16, %s2904_s26 }
 0x16f   : > { %1068 = vrot.lane.b32.xlu1 %v499_v12, %s2903_s29 }
 0x171   : > { %1070 = vrot.lane.b32.xlu0 %v500_v11, %s2903_s29 }
 0x173   : > { %1066 = vrot.lane.b32.xlu1 %v671_v18, %s2903_s29  ;;  %s2363_s29 = sshll.u32 %s2996_s23, 7 }
 0x175   : > { %1230 = vrot.lane.b32.xlu0 %v500_v11, %s2904_s26 }
 0x179   : > { %1228 = vrot.lane.b32.xlu0 %v499_v12, %s2904_s26 }
 0x17d   : > { %1226 = vrot.lane.b32.xlu0 %v671_v18, %s2904_s26  ;;  %s496_s26 = scalar_lea.vmem [#allocation14], %s3184_s19 }
 0x1d3   : > { %v3266_v24 = vpop.permute.xlu0 %830 }
 0x1d4   : > { %2447 = vmatpush3.xpose.msk.msra.mxu0 %vm672_vm2, %v3266_v24 }
 0x1d5   : > { %v907_v25 = vpop.permute.xlu1 %906  ;;  %2451 = vmatprep.subr.mxu0 %v2900_v0 }
 0x1d7   : > { %v3271_v26 = vpop.permute.xlu0 %990 }
 0x1d8   : > { %2459 = vmatpush3.xpose.msk.msra.mxu1 %vm672_vm2, %v3271_v26 }
 0x1d9   : > { %v989_v27 = vpop.permute.xlu1 %988  ;;  %2463 = vmatprep.subr.mxu1 %v2900_v0 }
 0x1db   : > { %2461 = vmatmul.mubr.msk.f32.vlgmr.msra.gmra.mxu1 %vm672_vm2, %v989_v27  ;;  %v829_v28 = vpop.permute.xlu0 %828 }
 0x1dc   : > { %2449 = vmatmul.mubr.msk.f32.vlgmr.msra.gmra.mxu0 %vm672_vm2, %v829_v28  ;;  %2467 = vmatprep.mubr.msk.f32.mxu1 %vm2901_vm0, %v2900_v0 }
 0x1dd   : > { %2452 = vmatpush3.xpose.msk.msra.mxu0 %vm672_vm2, %v911_v22  ;;  %2455 = vmatprep.mubr.msk.f32.mxu0 %vm2901_vm0, %v2900_v0  ;;  %v1149_v29 = vpop.permute.xlu1 %1148 }
 0x1de   : > { %2453 = vmatprep.subr.mxu0 %v2900_v0 }
 0x1df   : > { %v3284_v30 = vpop.permute.xlu0 %1150 }
 0x1e1   : > { %2454 = vmatpush3.xpose.msk.msra.mxu0 %vm672_vm2, %v909_v23  ;;  %v1069_v32 = vpop.permute.xlu1 %1068 }
 0x1e2   : > { %2470 = vmatprep.subr.mxu0 %v2900_v0 }
 0x1e3   : > { %v1071_v31 = vpop.permute.xlu0 %1070 }
 0x1e4   : > { %2456 = vmatmul.mubr.msk.f32.vlgmr.msra.gmra.mxu0 %vm672_vm2, %v907_v25  ;;  %2464 = vmatpush3.xpose.msk.msra.mxu1 %vm672_vm2, %v1071_v31 }
 0x1e5   : > { %2471 = vmatpush3.xpose.msk.msra.mxu0 %vm672_vm2, %v3284_v30  ;;  %2472 = vmatprep.mubr.msk.f32.mxu0 %vm2901_vm0, %v2900_v0  ;;  %v1067_v34 = vpop.permute.xlu1 %1066 }
 0x1e6   : > { %2465 = vmatprep.subr.mxu1 %v2900_v0  ;;  %2475 = vmatprep.subr.mxu0 %v2900_v0 }
 0x1e7   : > { %v1231_v33 = vpop.permute.xlu0 %1230 }
 0x1e8   : > { %2473 = vmatmul.mubr.msk.f32.vlgmr.msra.gmra.mxu0 %vm672_vm2, %v1149_v29  ;;  %2466 = vmatpush3.xpose.msk.msra.mxu1 %vm672_vm2, %v1069_v32 }
 0x1e9   : > { %2476 = vmatpush3.xpose.msk.msra.mxu0 %vm672_vm2, %v1231_v33  ;;  %2479 = vmatprep.mubr.msk.f32.mxu0 %vm2901_vm0, %v2900_v0 }
 0x1ea   : > { %2477 = vmatprep.subr.mxu0 %v2900_v0  ;;  %2482 = vmatprep.subr.mxu1 %v2900_v0 }
 0x1eb   : > { %2468 = vmatmul.mubr.msk.f32.vlgmr.msra.gmra.mxu1 %vm672_vm2, %v1067_v34  ;;  %v1229_v35 = vpop.permute.xlu0 %1228 }
 0x1ec   : > { %2484 = vmatprep.mubr.msk.f32.mxu1 %vm2901_vm0, %v2900_v0 }
 0x1ed   : > { %2478 = vmatpush3.xpose.msk.msra.mxu0 %vm672_vm2, %v1229_v35 }
 0x1ee   : > { %2492 = vmatprep.subr.mxu0 %v2900_v0 }
 0x1ef   : > { %v1227_v36 = vpop.permute.xlu0 %1226 }
 0x1f0   : > { %2480 = vmatmul.mubr.msk.f32.vlgmr.msra.gmra.mxu0 %vm672_vm2, %v1227_v36 }
 0x1f1   : > { %2494 = vmatprep.mubr.msk.f32.mxu0 %vm2901_vm0, %v2900_v0 }
 0x223   : > { %v824_v37 = vpop.f32.mrf.mxu1 }
 0x224   : > { %1432 = vst.msk [vmem:[#allocation2] sm:$0x80] %vm1431_vm3, %v824_v37  ;;  %1312 = vrot.lane.b32.xlu1 %v824_v37, %s2906_s2  ;;  %1329 = vrot.lane.b32.xlu0 %v824_v37, %s2907_s28  ;;  %v3314_v38 = vpop.f32.mrf.mxu0 }
 0x225   : > { %v2445_v39 = vpop.f32.mrf.mxu1 }
 0x226   : > { %v2438_v40 = vpop.f32.mrf.mxu0 }
 0x228   : > { %1346 = vrot.lane.b32.xlu1 %v824_v37, %s2908_s15  ;;  %1363 = vrot.lane.b32.xlu0 %v824_v37, %s2909_s25 }
 0x22c   : > { %1380 = vrot.lane.b32.xlu1 %v824_v37, %s2910_s27  ;;  %1397 = vrot.lane.b32.xlu0 %v824_v37, %s2911_s4 }
 0x230   : > { %1414 = vrot.lane.b32.xlu1 %v824_v37, %s2912_s3 }
 0x234   : > { %1452 = vperm.xlu1 %2630, %v824_v37  }
 0x296   : > { %v1313_v41 = vpop.permute.xlu1 %1312  ;;  %v1330_v42 = vpop.permute.xlu0 %1329 }
 0x297   : > { %1325 = vst.msk [vmem:[#allocation2] sm:$0x1] %vm1324_vm4, %v1313_v41 }
 0x298   : > { %1342 = vst.msk [vmem:[#allocation2] sm:$0x2] %vm1341_vm5, %v1330_v42 }
 0x29a   : > { %v1347_v43 = vpop.permute.xlu1 %1346  ;;  %v1364_v44 = vpop.permute.xlu0 %1363 }
 0x29b   : > { %1359 = vst.msk [vmem:[#allocation2] sm:$0x4] %vm1358_vm6, %v1347_v43  ;;  %v3325_v45 = vpop.f32.mrf.mxu1 }
 0x29c   : > { %1376 = vst.msk [vmem:[#allocation2] sm:$0x8] %vm1375_vm7, %v1364_v44  ;;  %v3327_v46 = vpop.f32.mrf.mxu0 }
 0x29d   : > { %v2462_v47 = vpop.f32.mrf.mxu1 }
 0x29e   : > { %v1381_v48 = vpop.permute.xlu1 %1380  ;;  %v1398_v49 = vpop.permute.xlu0 %1397 }
 0x29f   : > { %1393 = vst.msk [vmem:[#allocation2] sm:$0x10] %vm1392_vm8, %v1381_v48  ;;  %v2450_v50 = vpop.f32.mrf.mxu0 }
 0x2a0   : > { %1410 = vst.msk [vmem:[#allocation2] sm:$0x20] %vm1409_vm9, %v1398_v49 }
 0x2a2   : > { %v1415_v51 = vpop.permute.xlu1 %1414 }
 0x2a3   : > { %1427 = vst.msk [vmem:[#allocation2] sm:$0x40] %vm1426_vm10, %v1415_v51 }
 0x2a4   : > { %v984_v52 = vpop.f32.mrf.mxu0 }
 0x2a5   : > { %1433 = vst.msk [vmem:[#allocation2 + $0x8] sm:$0x80] %vm1431_vm3, %v984_v52  ;;  %1331 = vrot.lane.b32.xlu1 %v984_v52, %s2907_s28  ;;  %1314 = vrot.lane.b32.xlu0 %v984_v52, %s2906_s2 }
 0x2a6   : > { %v2457_v53 = vpop.f32.mrf.mxu0 }
 0x2a8   : > { %v3335_v54 = vpop.f32.mrf.mxu0 }
 0x2a9   : > { %1365 = vrot.lane.b32.xlu1 %v984_v52, %s2909_s25  ;;  %1348 = vrot.lane.b32.xlu0 %v984_v52, %s2908_s15 }
 0x2aa   : > { %v2474_v55 = vpop.f32.mrf.mxu0  ;;  %v1436_v1 = vld [vmem:[#allocation2] sm:$0xff] }
 0x2ab   : > { %v1144_v56 = vpop.f32.mrf.mxu1  ;;  %v1444_v3 = vadd.f32 %v1436_v1, %v3314_v38 }
 0x2ac   : > { %1434 = vst.msk [vmem:[#allocation2 + $0x10] sm:$0x80] %vm1431_vm3, %v1144_v56 }
 0x2ad   : > { %1399 = vrot.lane.b32.xlu1 %v984_v52, %s2911_s4  ;;  %1382 = vrot.lane.b32.xlu0 %v984_v52, %s2910_s27  ;;  %v2469_v57 = vpop.f32.mrf.mxu1 }
 0x2af   : > { %v1453_v63 = vpop.permute.xlu1 %1452 }
 0x2b0   : > { %v1304_v58 = vpop.f32.mrf.mxu0  ;;  %v1467_v2 = vsel %vm1448_vm11, %v1453_v63, 0.0 }
 0x2b1   : > { %1333 = vrot.lane.b32.xlu1 %v1144_v56, %s2907_s28  ;;  %1416 = vrot.lane.b32.xlu0 %v984_v52, %s2912_s3  ;;  %1435 = vst.msk [vmem:[#allocation2 + $0x18] sm:$0x80] %vm1431_vm3, %v1304_v58  ;;  %v3368_v4 = vadd.f32 %v1467_v2, %v1444_v3 }
 0x2b2   : > { %v2481_v59 = vpop.f32.mrf.mxu0 }
 0x2b3   : > { %v1475_v5 = vsel %vm672_vm2, %v3368_v4, -inf }
 0x2b5   : > { %1367 = vrot.lane.b32.xlu1 %v1144_v56, %s2909_s25  ;;  %1316 = vrot.lane.b32.xlu0 %v1144_v56, %s2906_s2 }
 0x2b9   : > { %1401 = vrot.lane.b32.xlu1 %v1144_v56, %s2911_s4  ;;  %1350 = vrot.lane.b32.xlu0 %v1144_v56, %s2908_s15 }
 0x2bd   : > { %1384 = vrot.lane.b32.xlu0 %v1144_v56, %s2910_s27  ;;  %1318 = vrot.lane.b32.xlu1 %v1304_v58, %s2906_s2  ;;  %s2177_s2 = sshll.u32 %s496_s26, 4  ;;  %s2178_s2 = int_to_ptr.vmem [resolvable:$true] %s2177_s2 }
 0x2c1   : > { %1418 = vrot.lane.b32.xlu0 %v1144_v56, %s2912_s3  ;;  %1352 = vrot.lane.b32.xlu1 %v1304_v58, %s2908_s15 }
 0x2c5   : > { %1335 = vrot.lane.b32.xlu0 %v1304_v58, %s2907_s28  ;;  %1386 = vrot.lane.b32.xlu1 %v1304_v58, %s2910_s27  ;;  %s2164_s27 = scalar_lea.sflag [#allocation5], %s3181_s22 }
 0x2c9   : > { %1369 = vrot.lane.b32.xlu0 %v1304_v58, %s2909_s25  ;;  %1460 = vperm.xlu1 %2630, %v1144_v56   ;;  %s2175_s25 = scalar_lea.hbm %s3507_s11, %s2363_s29 }
 0x2cd   : > { %1403 = vrot.lane.b32.xlu0 %v1304_v58, %s2911_s4  ;;  %1420 = vrot.lane.b32.xlu1 %v1304_v58, %s2912_s3  ;;  %s2810_s4 = scalar_lea.vmem %s2178_s2, 128  ;;  %s2914_s3 = smov [#allocation14]  }
 0x2ce   : > { %p2811_p2 = scmp.ne.s32.totalorder %s2178_s2, %s2810_s4 }
 0x2d0   : > { %p2812_p11 = pnand %p2811_p2, %p3543_p9 }
 0x2d1   : > { %1456 = vperm.xlu0 %2631, %v984_v52   ;;  %1464 = vperm.xlu1 %2630, %v1304_v58  }
 0x2d2   : > { %p2813_p13 = pneg %p2812_p11 }
 0x2f0   : > { %1476 = vmax.xlane.f32.xlu0 %v1475_v5 }
 0x317   : > { %v1332_v6 = vpop.permute.xlu1 %1331  ;;  %v1315_v7 = vpop.permute.xlu0 %1314 }
 0x318   : > { %1343 = vst.msk [vmem:[#allocation2 + $0x8] sm:$0x2] %vm1341_vm5, %v1332_v6 }
 0x319   : > { %1326 = vst.msk [vmem:[#allocation2 + $0x8] sm:$0x1] %vm1324_vm4, %v1315_v7 }
 0x31b   : > { %v1366_v8 = vpop.permute.xlu1 %1365  ;;  %v1349_v10 = vpop.permute.xlu0 %1348 }
 0x31c   : > { %1377 = vst.msk [vmem:[#allocation2 + $0x8] sm:$0x8] %vm1375_vm7, %v1366_v8 }
 0x31d   : > { %1360 = vst.msk [vmem:[#allocation2 + $0x8] sm:$0x4] %vm1358_vm6, %v1349_v10 }
 0x31f   : > { %v1400_v11 = vpop.permute.xlu1 %1399  ;;  %v1383_v12 = vpop.permute.xlu0 %1382 }
 0x320   : > { %1411 = vst.msk [vmem:[#allocation2 + $0x8] sm:$0x20] %vm1409_vm9, %v1400_v11 }
 0x321   : > { %1394 = vst.msk [vmem:[#allocation2 + $0x8] sm:$0x10] %vm1392_vm8, %v1383_v12 }
 0x323   : > { %v1334_v13 = vpop.permute.xlu1 %1333  ;;  %v1417_v14 = vpop.permute.xlu0 %1416 }
 0x324   : > { %1344 = vst.msk [vmem:[#allocation2 + $0x10] sm:$0x2] %vm1341_vm5, %v1334_v13 }
 0x325   : > { %1428 = vst.msk [vmem:[#allocation2 + $0x8] sm:$0x40] %vm1426_vm10, %v1417_v14  ;;  %v1831_v14 = vld [vmem:[#allocation12] sm:$0xff] }
 0x327   : > { %v1368_v15 = vpop.permute.xlu1 %1367  ;;  %v1317_v17 = vpop.permute.xlu0 %1316 }
 0x328   : > { %1378 = vst.msk [vmem:[#allocation2 + $0x10] sm:$0x8] %vm1375_vm7, %v1368_v15 }
 0x329   : > { %1327 = vst.msk [vmem:[#allocation2 + $0x10] sm:$0x1] %vm1324_vm4, %v1317_v17 }
 0x32b   : > { %v1402_v18 = vpop.permute.xlu1 %1401  ;;  %v1351_v19 = vpop.permute.xlu0 %1350 }
 0x32c   : > { %1412 = vst.msk [vmem:[#allocation2 + $0x10] sm:$0x20] %vm1409_vm9, %v1402_v18  ;;  %v1437_v38 = vld [vmem:[#allocation2 + $0x8] sm:$0xff] }
 0x32d   : > { %1361 = vst.msk [vmem:[#allocation2 + $0x10] sm:$0x4] %vm1358_vm6, %v1351_v19  ;;  %v1445_v39 = vadd.f32 %v1437_v38, %v3327_v46 }
 0x32f   : > { %v1385_v20 = vpop.permute.xlu0 %1384  ;;  %v1319_v21 = vpop.permute.xlu1 %1318 }
 0x330   : > { %1395 = vst.msk [vmem:[#allocation2 + $0x10] sm:$0x10] %vm1392_vm8, %v1385_v20 }
 0x331   : > { %1328 = vst.msk [vmem:[#allocation2 + $0x18] sm:$0x1] %vm1324_vm4, %v1319_v21 }
 0x333   : > { %v1419_v22 = vpop.permute.xlu0 %1418  ;;  %v1353_v23 = vpop.permute.xlu1 %1352 }
 0x334   : > { %1429 = vst.msk [vmem:[#allocation2 + $0x10] sm:$0x40] %vm1426_vm10, %v1419_v22  ;;  %v1832_v22 = vld [vmem:[#allocation12 + $0x8] sm:$0xff] }
 0x335   : > { %1362 = vst.msk [vmem:[#allocation2 + $0x18] sm:$0x4] %vm1358_vm6, %v1353_v23  ;;  %v1833_v23 = vld [vmem:[#allocation12 + $0x10] sm:$0xff] }
 0x337   : > { %v1336_v25 = vpop.permute.xlu0 %1335  ;;  %v1387_v27 = vpop.permute.xlu1 %1386 }
 0x338   : > { %1345 = vst.msk [vmem:[#allocation2 + $0x18] sm:$0x2] %vm1341_vm5, %v1336_v25 }
 0x339   : > { %1396 = vst.msk [vmem:[#allocation2 + $0x18] sm:$0x10] %vm1392_vm8, %v1387_v27 }
 0x33b   : > { %v1370_v28 = vpop.permute.xlu0 %1369  ;;  %v1438_v31 = vld [vmem:[#allocation2 + $0x10] sm:$0xff] }
 0x33c   : > { %1379 = vst.msk [vmem:[#allocation2 + $0x18] sm:$0x8] %vm1375_vm7, %v1370_v28  ;;  %v1446_v32 = vadd.f32 %v1438_v31, %v3325_v45  ;;  %v1834_v31 = vld [vmem:[#allocation12 + $0x18] sm:$0xff] }
 0x33f   : > { %v1404_v29 = vpop.permute.xlu0 %1403 }
 0x340   : > { %1413 = vst.msk [vmem:[#allocation2 + $0x18] sm:$0x20] %vm1409_vm9, %v1404_v29 }
 0x344   : > { %v1461_v33 = vpop.permute.xlu1 %1460 }
 0x345   : > { %v1469_v34 = vsel %vm1448_vm11, %v1461_v33, 0.0 }
 0x346   : > { %v1473_v35 = vadd.f32 %v1469_v34, %v1446_v32 }
 0x348   : > { %v1421_v36 = vpop.permute.xlu1 %1420  ;;  %v1481_v37 = vsel %vm672_vm2, %v1473_v35, -inf }
 0x349   : > { %1430 = vst.msk [vmem:[#allocation2 + $0x18] sm:$0x40] %vm1426_vm10, %v1421_v36  ;;  %1482 = vmax.xlane.f32.xlu0 %v1481_v37 }
 0x34c   : > { %v1457_v40 = vpop.permute.xlu0 %1456  ;;  %v1465_v43 = vpop.permute.xlu1 %1464 }
 0x34d   : > { %v1468_v41 = vsel %vm1448_vm11, %v1457_v40, 0.0  ;;  %v1470_v48 = vsel %vm1448_vm11, %v1465_v43, 0.0  ;;  %v2355_v40 = vld [vmem:[%s3504_s8] ss:$0 sm:$0xff] }
 0x34e   : > { %v1472_v42 = vadd.f32 %v1468_v41, %v1445_v39 }
 0x350   : > { %v1439_v44 = vld [vmem:[#allocation2 + $0x18] sm:$0xff]  ;;  %v1478_v45 = vsel %vm672_vm2, %v1472_v42, -inf }
 0x351   : > { %v1447_v47 = vadd.f32 %v1439_v44, %v3335_v54  ;;  %1479 = vmax.xlane.f32.xlu1 %v1478_v45 }
 0x353   : > { %v1474_v49 = vadd.f32 %v1470_v48, %v1447_v47 }
 0x355   : > { %v1484_v46 = vsel %vm672_vm2, %v1474_v49, -inf }
 0x356   : > { %1485 = vmax.xlane.f32.xlu0 %v1484_v46 }
 0x362   : > { %1519 = vrot.lane.b32.xlu1 %v3249_v16, %s2913_s24 }
 0x379   : > { %v1477_v50 = vpop.xlane.xlu0 %1476 }
 0x37a   : > { %v1487_v51 = vsub.f32 %v3368_v4, %v1477_v50 }
 0x37c   : > { %v1491_v52 = vmul.f32 1.442695, %v1487_v51 }
 0x37e   : > { %2632 = vpow2.f32 %v1491_v52 }
 0x38b   : > { %v2633_v53 = vpop.eup %2632 }
 0x38c   : > { %v1499_v54 = vsel %vm672_vm2, %v2633_v53, 0.0 }
 0x38d   : > { %1500 = vadd.xlane.f32.xlu1 %v1499_v54 }
 0x3d2   : > { %v1483_v55 = vpop.xlane.xlu0 %1482 }
 0x3d3   : > { %v1489_v56 = vsub.f32 %v1473_v35, %v1483_v55 }
 0x3d5   : > { %v1495_v57 = vmul.f32 1.442695, %v1489_v56 }
 0x3d7   : > { %2634 = vpow2.f32 %v1495_v57 }
 0x3da   : > { %v1480_v58 = vpop.xlane.xlu1 %1479 }
 0x3db   : > { %v1488_v59 = vsub.f32 %v1472_v42, %v1480_v58 }
 0x3dd   : > { %v1493_v60 = vmul.f32 1.442695, %v1488_v59 }
 0x3de   : > { %v1520_v61 = vpop.permute.xlu1 %1519 }
 0x3df   : > { %2636 = vpow2.f32 %v1493_v60  ;;  %2483 = vmatpush3.msra.mxu1 %v1520_v61  ;;  %v1486_v16 = vpop.xlane.xlu0 %1485  ;;  %v2361_v60 = vld [vmem:[%s3506_s10] ss:$0 sm:$0xff] }
 0x3e0   : > { %v1490_v62 = vsub.f32 %v1474_v49, %v1486_v16  ;;  %2487 = vmatprep.subr.mxu1 %v2900_v0 }
 0x3e2   : > { %v1497_v63 = vmul.f32 1.442695, %v1490_v62 }
 0x3e4   : > { %v2635_v1 = vpop.eup %2634  ;;  %2638 = vpow2.f32 %v1497_v63 }
 0x3e5   : > { %v1505_v2 = vsel %vm672_vm2, %v2635_v1, 0.0 }
 0x3e6   : > { %1506 = vadd.xlane.f32.xlu1 %v1505_v2 }
 0x3ec   : > { %v2637_v3 = vpop.eup %2636 }
 0x3ed   : > { %v1502_v4 = vsel %vm672_vm2, %v2637_v3, 0.0 }
 0x3ee   : > { %1503 = vadd.xlane.f32.xlu0 %v1502_v4 }
 0x3f1   : > { %v2639_v5 = vpop.eup %2638 }
 0x3f2   : > { %v1508_v6 = vsel %vm672_vm2, %v2639_v5, 0.0 }
 0x3f3   : > { %1509 = vadd.xlane.f32.xlu0 %v1508_v6 }
 0x3f7   : > { %1671 = vrot.lane.b32.xlu1 %v3271_v26, %s2913_s24 }
 0x3fb   : > { %1747 = vrot.lane.b32.xlu1 %v3284_v30, %s2913_s24 }
 0x409   : > { %1595 = vrot.lane.b32.xlu0 %v3266_v24, %s2913_s24  ;;  %s2814_s24 = sshll.u32 %s2914_s3, 4  ;;  %s2815_s24 = int_to_ptr.vmem [resolvable:$false] %s2814_s24 }
 0x40a   : > { %s2816_s23 = scalar_lea.vmem %s2815_s24, 256  ;;  %p2817_p1 = scmp.lt.s32.totalorder %s2178_s2, %s2815_s24 }
 0x40b   : > { %p2818_p4 = scmp.lt.s32.totalorder %s2816_s23, %s2810_s4 }
 0x40d   : > { %p2819_p6 = por %p2818_p4, %p2817_p1 }
 0x40f   : > { %p2820_p10 = pnand %p2819_p6, %p2813_p13 }
 0x416   : > { %v1501_v7 = vpop.xlane.xlu1 %1500 }
 0x417   : > { %2640 = vrcp.f32 %v1501_v7 }
 0x424   : > { %v2641_v8 = vpop.eup %2640 }
 0x425   : > { %v1515_v10 = vmul.f32 %v2641_v8, %v2633_v53 }
 0x427   : > { %2485 = vmatmul.mubr.msk.f32.vlgmr.msra.gmra.mxu1 %vm672_vm2, %v1515_v10 }
 0x428   : > { %2489 = vmatprep.mubr.msk.f32.mxu1 %vm2901_vm0, %v2900_v0 }
 0x46f   : > { %v1507_v11 = vpop.xlane.xlu1 %1506 }
 0x470   : > { %2642 = vrcp.f32 %v1507_v11 }
 0x473   : > { %v1672_v12 = vpop.permute.xlu1 %1671 }
 0x474   : > { %2493 = vmatpush3.msra.mxu0 %v1672_v12 }
 0x475   : > { %2502 = vmatprep.subr.mxu0 %v2900_v0 }
 0x477   : > { %v1504_v26 = vpop.xlane.xlu0 %1503  ;;  %v1748_v19 = vpop.permute.xlu1 %1747 }
 0x478   : > { %2644 = vrcp.f32 %v1504_v26 }
 0x47c   : > { %v1510_v30 = vpop.xlane.xlu0 %1509 }
 0x47d   : > { %v2643_v13 = vpop.eup %2642  ;;  %2646 = vrcp.f32 %v1510_v30 }
 0x47e   : > { %v1517_v24 = vmul.f32 %v2643_v13, %v2635_v1 }
 0x480   : > { %2495 = vmatmul.mubr.msk.f32.vlgmr.msra.gmra.mxu0 %vm672_vm2, %v1517_v24  ;;  %v1596_v15 = vpop.permute.xlu0 %1595 }
 0x481   : > { %2488 = vmatpush3.msra.mxu1 %v1596_v15  ;;  %2503 = vmatpush3.msra.mxu0 %v1831_v14 }
 0x482   : > { %2497 = vmatprep.subr.mxu1 %v2900_v0  ;;  %2504 = vmatprep.mubr.msk.f32.mxu0 %vm2901_vm0, %v2900_v0 }
 0x483   : > { %2512 = vmatprep.subr.mxu0 %v2900_v0 }
 0x485   : > { %v2645_v17 = vpop.eup %2644 }
 0x486   : > { %v1516_v18 = vmul.f32 %v2645_v17, %v2637_v3 }
 0x488   : > { %2490 = vmatmul.mubr.msk.f32.vlgmr.msra.gmra.mxu1 %vm672_vm2, %v1516_v18 }
 0x489   : > { %2498 = vmatpush3.msra.mxu1 %v1748_v19  ;;  %2499 = vmatprep.mubr.msk.f32.mxu1 %vm2901_vm0, %v2900_v0 }
 0x48a   : > { %v2647_v20 = vpop.eup %2646  ;;  %2507 = vmatprep.subr.mxu1 %v2900_v0 }
 0x48b   : > { %v1518_v21 = vmul.f32 %v2647_v20, %v2639_v5 }
 0x48d   : > { %2500 = vmatmul.mubr.msk.f32.vlgmr.msra.gmra.mxu1 %vm672_vm2, %v1518_v21 }
 0x48e   : > { %2509 = vmatprep.mubr.msk.f32.mxu1 %vm2901_vm0, %v2900_v0  ;;  %2508 = vmatpush3.msra.mxu1 %v1832_v22 }
 0x48f   : > { %2517 = vmatprep.subr.mxu1 %v2900_v0 }
 0x4e7   : > { %v1591_v25 = vpop.f32.mrf.mxu1 }
 0x4e8   : > { %2505 = vmatmul.mubr.msk.f32.vlgmr.msra.gmra.mxu0 %vm672_vm2, %v1591_v25 }
 0x4e9   : > { %v2486_v27 = vpop.f32.mrf.mxu1  ;;  %2513 = vmatpush3.msra.mxu0 %v1833_v23  ;;  %2514 = vmatprep.mubr.msk.f32.mxu0 %vm2901_vm0, %v2900_v0 }
 0x540   : > { %v1743_v28 = vpop.f32.mrf.mxu0 }
 0x541   : > { %2515 = vmatmul.mubr.msk.f32.vlgmr.msra.gmra.mxu0 %vm672_vm2, %v1743_v28 }
 0x542   : > { %v2496_v29 = vpop.f32.mrf.mxu0 }
 0x548   : > { %v1667_v32 = vpop.f32.mrf.mxu1 }
 0x549   : > { %2510 = vmatmul.mubr.msk.f32.vlgmr.msra.gmra.mxu1 %vm672_vm2, %v1667_v32 }
 0x54a   : > { %v2491_v33 = vpop.f32.mrf.mxu1  ;;  %2518 = vmatpush3.msra.mxu1 %v1834_v31  ;;  %2519 = vmatprep.mubr.msk.f32.mxu1 %vm2901_vm0, %v2900_v0 }
 0x54d   : > { %v1819_v34 = vpop.f32.mrf.mxu1 }
 0x54e   : > { %2520 = vmatmul.mubr.msk.f32.vlgmr.msra.gmra.mxu1 %vm672_vm2, %v1819_v34 }
 0x54f   : > { %v2501_v35 = vpop.f32.mrf.mxu1 }
 0x5a8   : > { %v1904_v36 = vpop.f32.mrf.mxu0 }
 0x5a9   : > { %v1908_v41 = vadd.f32 %v2355_v40, %v1904_v36 }
 0x5aa   : > { %v2506_v37 = vpop.f32.mrf.mxu0 }
 0x601   : > { %v2052_v38 = vpop.f32.mrf.mxu0 }
 0x603   : > { %v2516_v39 = vpop.f32.mrf.mxu0 }
 0x609   : > { %v1978_v42 = vpop.f32.mrf.mxu1 }
 0x60a   : > { %v1982_v43 = vadd.f32 %v1978_v42, %v1908_v41 }
 0x60b   : > { %v2511_v44 = vpop.f32.mrf.mxu1 }
 0x60c   : > { %v2056_v45 = vadd.f32 %v2052_v38, %v1982_v43 }
 0x60e   : > { %v2126_v47 = vpop.f32.mrf.mxu1 }
 0x60f   : > { %v2130_v48 = vadd.f32 %v2126_v47, %v2056_v45 }
 0x610   : > { %v2521_v0 = vpop.f32.mrf.mxu1 }
 0x611   : > { %v2131_v49 = vadd.f32 %v2130_v48, %v3222_v9  ;;  %v2360_v9 = vld [vmem:[%s3505_s9] ss:$0 sm:$0xff] }
 0x613   : > { %v2132_v46 = vsel %vm505_vm1, %v2131_v49, 0.0 }
 0x614   : > { %2133 = vadd.xlane.f32.xlu0 %v2132_v46 }
 0x69d   : > { %v2134_v50 = vpop.xlane.xlu0 %2133 }
 0x69e   : > { %v2136_v51 = vmul.f32 0.03125, %v2134_v50 }
 0x6a0   : > { %v2137_v52 = vsub.f32 %v2131_v49, %v2136_v51 }
 0x6a2   : > { %v2138_v53 = vmul.f32 %v2137_v52, %v2137_v52 }
 0x6a4   : > { %v2139_v54 = vsel %vm505_vm1, %v2138_v53, 0.0 }
 0x6a5   : > { %2140 = vadd.xlane.f32.xlu1 %v2139_v54 }
 0x72e   : > { %v2141_v55 = vpop.xlane.xlu1 %2140 }
 0x72f   : > { %v2142_v56 = vmul.f32 0.03125, %v2141_v55 }
 0x731   : > { %v2143_v57 = vadd.f32 1e-05, %v2142_v56 }
 0x733   : > { %2648 = vrsqrt.f32 %v2143_v57 }
 0x740   : > { %v2649_v58 = vpop.eup %2648 }
 0x741   : > { %v2145_v59 = vmul.f32 %v2649_v58, %v2137_v52 }
 0x743   : > { %v2153_v61 = vmul.f32 %v2360_v9, %v2145_v59 }
 0x745   : > { %v2161_v16 = vadd.f32 %v2361_v60, %v2153_v61 }
 0x747   : > { %2162 = vst.msk [vmem:[%s496_s26] sm:$0xff] %vm505_vm1, %v2161_v16 }
 0x748   : > { %2823 = shalt.err (!%p2820_p10)
}
 0x749   : > { %s2824_s19 = scalar_lea.hbm %s2175_s25, 128  ;;  %s2828_s12 = scalar_lea.hbm %s3507_s11, 256 }
 0x74a   : > { %p2825_p3 = scmp.ne.s32.totalorder %s2175_s25, %s2824_s19  ;;  %p2829_p8 = scmp.lt.s32.totalorder %s2175_s25, %s3507_s11 }
 0x74b   : > { %p2830_p12 = scmp.lt.s32.totalorder %s2828_s12, %s2824_s19 }
 0x74c   : > { %p2826_p7 = pnand %p2825_p3, %p3543_p9 }
 0x74d   : > { %p2831_p0 = por %p2830_p12, %p2829_p8 }
 0x74e   : > { %p2827_p5 = pneg %p2826_p7 }
 0x750   : > { %p2832_p2 = pnand %p2831_p0, %p2827_p5 }
 0x752   : > { %2835 = shalt.err (!%p2832_p2)
}
 0x753   : > { %2542 = dma.vmem_to_hbm [thread:$0]  (%p3543_p9), %s2178_s2, 128, %s2175_s25, %s2164_s27  }
 0x754 PF: > { %s3544_s7 = sld [smem:[#allocation24_spill]]  ;;  %s2189_s13 = sand.u32 1, %s2878_s17  }
 0x755   : > { %p3546_p13 = scmp.ge.s32.totalorder %s2890_s20, 2  ;;  %s2190_s29 = scalar_lea.sflag [#allocation5], %s2189_s13 }
 0x75a   : > { %p3545_p11 = scmp.ne.s32.totalorder %s3544_s7, 0 }
 0x75c   : > { %p2565_p1 = pnand %p3546_p13, %p3545_p11 }
 0x75e   : > { %p2566_p4 = pneg %p2565_p1 }
 0x760   : > { %2873 = dma.done.wait (%p2566_p4), %s2190_s29, 128  }
 0x761   : > { %2875 = vsyncadd (%p2566_p4), %s2190_s29, 4294967168  ;;  %s3547_s20 = sld [smem:[#allocation22_spill]]  ;;  %s3550_s17 = smov %s2882_s18 }
 0x762   : > { %s3548_s26 = sld [smem:[#allocation21_spill]] }
 0x763   : > { %s3549_s19 = sld [smem:[#allocation23_spill]] }
 0x767   : > { %p29_p6 = scmp.ge.s32.totalorder %s3547_s20, 4  }
 0x768   : > { %s3551_s18 = smov %s3548_s26 }
 0x769   :  { %31 = sbr.rel (!%p29_p6) target bundleno = 14 (0xe), region = 138 }
 0x76e   :  { %2195 = vsyncpa [#allocation4], 1 }
 0x76f   :  { %2197 = vsyncpa [#allocation4 + $0x1], 1 }
 0x770   :  { %2198 = vsyncpa [#allocation7], 1 }
 0x771   :  { %2200 = vsyncpa [#allocation7 + $0x1], 1 }
 0x772   :  { %2201 = vsyncpa [#allocation10], 1 }
 0x773   :  { %2202 = vsyncpa [#allocation13], 1 }
 0x774   :  { %2203 = vsyncpa [#allocation5], 1 }
 0x775   :  { %2205 = vsyncpa [#allocation5 + $0x1], 1 }

</bundles_post_ra>
